<compile_context>
chip_gen: v5e
topology: v5e:2x2
jax: 0.10.0
libtpu: 0.0.40
codegen_flags: <defaults>
</compile_context>

<pallas_src>
import functools

import numpy as np
import jax
import jax.numpy as jnp
from jax import lax
from jax.experimental import pallas as pl
from jax.experimental.pallas import tpu as pltpu

_LN_EPS = 1e-5
_NUM_STAGES = 6


# ----------------------------- Pallas kernel --------------------------------
def _byte_embedding_kernel(aon_ref, b2_ref,                 # SMEM scalars (6,)
                           emb_ref,                         # [BB,S,HP] bf16 (resident)
                           ng_ref,                          # [BB,1,S,HP] bf16 (per-stage stream)
                           we_ref, wg_ref,                  # [1,HP,2HP] f32 (per-stage stream)
                           b1_ref, lng_ref, lnb_ref,        # [6,HP] residual-gate bias / LN
                           w2_ref, bp_ref,                  # [6,HP] gate Linear(H->1) w, proj bias
                           g_ref, beta_ref,                 # [1,HP] final LayerNorm
                           out_ref,                         # [BB,S,HP] f32 (accumulator + output)
                           *, true_h):
    i = pl.program_id(1)                  # n-gram stage index, n = i + 3
    n_stages = pl.num_programs(1)
    BB, S, HP = out_ref.shape
    R = BB * S
    inv_h = 1.0 / true_h

    # masks: true-H lanes for LayerNorm stats, valid sequence rows for writeback
    lane = lax.broadcasted_iota(jnp.int32, (1, HP), 1)
    lmask = (lane < true_h).astype(jnp.float32)                      # (1, HP)
    pos = lax.broadcasted_iota(jnp.int32, (BB, S, 1), 1)

    # running embedding lives in the output block (same block index across the
    # stage axis -> resident); initialize from the byte embeddings at stage 0.
    @pl.when(i == 0)
    def _():
        out_ref[...] = emb_ref[...].astype(jnp.float32)

    e = out_ref[...]                                                 # (BB, S, HP) f32
    e2 = e.reshape(R, HP)
    # gated n-gram embeds; alpha_n / n prefolded host-side into one SMEM scalar.
    gated = (ng_ref[:, 0, :, :].astype(jnp.float32) * aon_ref[i]).reshape(R, HP)

    # Two fused matmuls, N = 2*HP: columns [:HP] feed the residual gate,
    # columns [HP:] feed the projection.
    # TODO(synk): at production H switch we/wg + MXU inputs to bf16 (2x MXU
    # rate on v6e/v7x, halves weight DMA) and tile the 2H output dim if H>=1024.
    ep = jnp.dot(e2, we_ref[0], preferred_element_type=jnp.float32)      # (R, 2HP)
    gp = jnp.dot(gated, wg_ref[0], preferred_element_type=jnp.float32)   # (R, 2HP)

    # residual gate: Linear(2H->H) -> LayerNorm -> GELU -> Linear(H->1) -> Sigmoid
    # (padded lanes of h are exactly zero: weights/biases are zero-padded)
    h = ep[:, :HP] + gp[:, :HP] + b1_ref[i][None, :]
    mu = jnp.sum(h, axis=-1, keepdims=True) * inv_h
    d = (h - mu) * lmask
    var = jnp.sum(d * d, axis=-1, keepdims=True) * inv_h
    h = d * lax.rsqrt(var + _LN_EPS) * lng_ref[i][None, :] + lnb_ref[i][None, :]
    # TODO(synk): nn.GELU() default is exact erf-GELU; erf lowering is not
    # guaranteed in Mosaic, so the tanh approximation is used in-kernel.
    h = 0.5 * h * (1.0 + jnp.tanh(0.7978845608028654 * (h + 0.044715 * h * h * h)))
    logit = jnp.sum(h * w2_ref[i][None, :], axis=-1, keepdims=True) + b2_ref[i]
    r = pl.reciprocal(1.0 + jnp.exp(-logit), approx=True)            # sigmoid on EUP

    # (gated * r) @ Wp_g == r * (gated @ Wp_g): projection half never waits on sigmoid
    proj = (ep[:, HP:] + r * gp[:, HP:] + bp_ref[i][None, :]).reshape(BB, S, HP)

    # full-tile compute, masked writeback: rows >= L = S - n + 1 keep their value
    e_new = jnp.where(pos < (S - i - 2), proj, e)

    @pl.when(i < n_stages - 1)
    def _():
        out_ref[...] = e_new

    @pl.when(i == n_stages - 1)
    def _():
        # final LayerNorm over the true hidden dim, straight into the output block
        mu_f = jnp.sum(e_new, axis=-1, keepdims=True) * inv_h
        d_f = (e_new - mu_f) * lmask
        var_f = jnp.sum(d_f * d_f, axis=-1, keepdims=True) * inv_h
        out_ref[...] = d_f * lax.rsqrt(var_f + _LN_EPS) * g_ref[...] + beta_ref[...]


# ------------------------ chip-aware sizing helpers --------------------------
def _vmem_cap_budget():
    """Ceiling for vmem_limit_bytes: ~48 MiB on v7x (64 MiB/TC), ~96 MiB on v5e/v6e."""
    phys = 64 << 20
    try:
        info = pltpu.get_tpu_info()
        phys = int(getattr(info, "vmem_capacity_bytes", phys) or phys)
    except Exception:
        pass
    return min((phys * 3) // 4, 100 << 20)


def _choose_bb(B, S, HP, budget):
    """Batch rows per block: ~256-1024 MXU rows, >=2 parallel batch tiles, fits budget."""
    def footprint(bb):
        blk = bb * S * HP
        # double-buffered: ng(bf16) + emb(bf16) + out(f32) blocks + 2 per-stage weight blocks
        return 2 * (blk * (2 + 2 + 4) + 2 * (HP * 2 * HP) * 4)

    best = 1
    for d in range(B, 0, -1):
        if B % d:
            continue
        if d * S > 1024 and d > 1:
            continue                       # keep MXU row blocks in the sweet spot
        if B >= 2 and B // d < 2:
            continue                       # >=2 parallel batch tiles (v7x has 2 TCs)
        if footprint(d) > budget:
            continue
        best = d
        break
    return best


# ------------------------------ pallas_call ----------------------------------
def byte_embedding_pallas(embeds_p, ng_stack_p, alphas_over_n, fused, H):
    """embeds_p: [B,S,HP] bf16; ng_stack_p: [B,6,S,HP] bf16 (zero past each
    stage's valid length and in lanes >= H); alphas_over_n: [6] f32."""
    B, S, HP = embeds_p.shape

    cap = _vmem_cap_budget()
    BB = _choose_bb(B, S, HP, cap // 2)
    grid = (B // BB, _NUM_STAGES)

    smem = pl.BlockSpec(memory_space=pltpu.MemorySpace.SMEM)
    resident_vec = lambda shape: pl.BlockSpec(shape, lambda b, i: (0,) * len(shape))

    # VMEM budget from the real double-buffered footprint (+ headroom).
    blk = BB * S * HP
    need = (2 * (blk * (2 + 2 + 4) + 2 * (HP * 2 * HP) * 4)        # streamed/resident blocks
            + (5 * _NUM_STAGES * HP + 2 * HP) * 4)                 # small resident vectors
    vmem_limit = int(min(cap, max(need + (4 << 20), 16 << 20)))

    out_p = pl.pallas_call(
        functools.partial(_byte_embedding_kernel, true_h=H),
        out_shape=jax.ShapeDtypeStruct((B, S, HP), jnp.float32),
        grid=grid,
        in_specs=[
            smem,                                                       # alpha_n / n   (6,)
            smem,                                                       # rg_b2         (6,)
            pl.BlockSpec((BB, S, HP), lambda b, i: (b, 0, 0)),          # byte embeds (resident over stages)
            pl.BlockSpec((BB, 1, S, HP), lambda b, i: (b, i, 0, 0)),    # n-gram slab, streamed per stage
            pl.BlockSpec((1, HP, 2 * HP), lambda b, i: (i, 0, 0)),      # [w1_e | wp_e], streamed per stage
            pl.BlockSpec((1, HP, 2 * HP), lambda b, i: (i, 0, 0)),      # [w1_g | wp_g], streamed per stage
            resident_vec((_NUM_STAGES, HP)),                            # rg_b1
            resident_vec((_NUM_STAGES, HP)),                            # rg_ln_gamma
            resident_vec((_NUM_STAGES, HP)),                            # rg_ln_beta
            resident_vec((_NUM_STAGES, HP)),                            # rg_w2
            resident_vec((_NUM_STAGES, HP)),                            # proj_b
            resident_vec((1, HP)),                                      # ln_gamma
            resident_vec((1, HP)),                                      # ln_beta
        ],
        out_specs=pl.BlockSpec((BB, S, HP), lambda b, i: (b, 0, 0)),    # accumulator across stages
        compiler_params=pltpu.CompilerParams(
            dimension_semantics=("parallel", "arbitrary"),
            vmem_limit_bytes=vmem_limit),
    )(
        alphas_over_n, fused["b2"], embeds_p, ng_stack_p,
        fused["we"], fused["wg"],
        fused["b1"], fused["lng"], fused["lnb"], fused["w2"], fused["bp"],
        fused["ln_g"], fused["ln_b"],
    )
    return out_p[..., :H]                                               # drop lane padding


# ------------------------- one-time param preparation -------------------------
def prepare_fused_params(params, H, HP):
    """Fuse the two Linear(2H->H) of each stage along the output dim, zero-pad the
    hidden dim to HP (lane-dense), and pre-pad the embedding tables (bf16 HBM
    storage).  Called ONCE, not per forward call."""
    def pad_h(x, axis):
        pad = [(0, 0)] * x.ndim
        pad[axis] = (0, HP - H)
        return jnp.pad(x, pad)

    w1 = params["rg_w1"]           # (6, 2H, H), input-major
    wp = params["proj_w"]          # (6, 2H, H)
    w1_e, w1_g = w1[:, :H, :], w1[:, H:, :]
    wp_e, wp_g = wp[:, :H, :], wp[:, H:, :]

    def fuse(a, b):
        # (6,H,H) x2 -> (6, HP, 2HP): gate output in cols [0:H], proj output in [HP:HP+H]
        out = jnp.zeros((_NUM_STAGES, HP, 2 * HP), jnp.float32)
        out = out.at[:, :H, :H].set(a)
        out = out.at[:, :H, HP:HP + H].set(b)
        return out

    return {
        "we": fuse(w1_e, wp_e),
        "wg": fuse(w1_g, wp_g),
        "b1": pad_h(params["rg_b1"], 1).astype(jnp.float32),
        "lng": pad_h(params["rg_ln_g"], 1).astype(jnp.float32),
        "lnb": pad_h(params["rg_ln_b"], 1).astype(jnp.float32),
        "w2": pad_h(params["rg_w2"], 1).astype(jnp.float32),
        "bp": pad_h(params["proj_b"], 1).astype(jnp.float32),
        "b2": params["rg_b2"].astype(jnp.float32),
        "ln_g": pad_h(params["ln_g"].reshape(1, H), 1).astype(jnp.float32),
        "ln_b": pad_h(params["ln_b"].reshape(1, H), 1).astype(jnp.float32),
        # lane-padded, bf16 embedding tables -> gathers produce padded bf16 slabs directly
        "byte_emb_p": pad_h(params["byte_emb"], 1).astype(jnp.bfloat16),
        "ngram_emb_p": pad_h(params["ngram_emb"], 2).astype(jnp.bfloat16),
    }


# ------------------------------ glue (host/JAX) -------------------------------
def compute_ngram_hash_np(bytes_np, n, vocab_size):
    """Matches ByteEmbedding.compute_ngram_hash: float32 math, int64 trunc, mod."""
    batch, seq = bytes_np.shape
    if seq < n:
        return np.zeros((batch, 0), dtype=np.int32)
    L = seq - n + 1
    win = np.arange(L)[:, None] + np.arange(n)[None, :]
    ngrams = bytes_np[:, win].astype(np.float32)                       # [B, L, n]
    scale_factor = np.float32(1.0 - (n - 3) * 0.1)
    offset = np.float32((n - 3) * 37 % 256)
    weights = np.float32(256.0) ** np.arange(n, dtype=np.float32)
    hv = (ngrams * weights[None, None, :]).sum(axis=-1, dtype=np.float32)
    hv = hv * scale_factor + offset
    hv = hv.astype(np.int64)
    return (hv % np.int64(vocab_size)).astype(np.int32)


def init_params(key, H, V):
    ks = jax.random.split(key, 10)
    p = {}
    p["byte_emb"] = (jax.random.normal(ks[0], (256, H)) * 0.02).astype(jnp.float32)
    p["ngram_emb"] = (jax.random.normal(ks[1], (6, V, H)) * 0.02).astype(jnp.float32)
    # Linear weights stored input-major (already transposed vs. torch's [out, in]).
    p["proj_w"] = (jax.random.normal(ks[2], (6, 2 * H, H)) / np.sqrt(2 * H)).astype(jnp.float32)
    p["proj_b"] = (jax.random.normal(ks[3], (6, H)) * 0.02).astype(jnp.float32)
    p["rg_w1"] = (jax.random.normal(ks[4], (6, 2 * H, H)) / np.sqrt(2 * H)).astype(jnp.float32)
    p["rg_b1"] = (jax.random.normal(ks[5], (6, H)) * 0.02).astype(jnp.float32)
    p["rg_ln_g"] = jnp.ones((6, H), jnp.float32)
    p["rg_ln_b"] = jnp.zeros((6, H), jnp.float32)
    p["rg_w2"] = (jax.random.normal(ks[6], (6, H)) / np.sqrt(H)).astype(jnp.float32)
    p["rg_b2"] = (jax.random.normal(ks[7], (6,)) * 0.02).astype(jnp.float32)
    p["ln_g"] = jnp.ones((H,), jnp.float32)
    p["ln_b"] = jnp.zeros((H,), jnp.float32)
    p["noise_scale"] = jnp.float32(0.09)
    p["ngram_gates"] = jnp.ones((6,), jnp.float32)
    return p


def _prepare_inputs(bytes_input, params, fused, noise_key, H, V):
    """Embedding gathers (from padded bf16 tables), stochastic gate noise and
    n-gram hashing (host-side glue)."""
    B, S = bytes_input.shape
    HP = fused["byte_emb_p"].shape[-1]
    bytes_np = np.asarray(bytes_input)
    # byte embeddings (dropout = identity in eval mode) -> [B, S, HP] bf16
    embeds = jnp.take(fused["byte_emb_p"], bytes_input.astype(jnp.int32), axis=0)
    # stochastic gates: alpha_n = relu(gate_n + randn * sigmoid(noise_scale))
    noise = jax.random.normal(noise_key, (6,), jnp.float32) * jax.nn.sigmoid(params["noise_scale"])
    alphas = jax.nn.relu(params["ngram_gates"] + noise).astype(jnp.float32)
    # n-gram hash + embedding gather, zero padded to [B, S, HP], stacked batch-major
    ng_padded = []
    for i, n in enumerate(range(3, 9)):
        L = S - n + 1
        if L <= 0:
            ng_padded.append(jnp.zeros((B, S, HP), jnp.bfloat16))
            continue
        hashes = compute_ngram_hash_np(bytes_np, n, V)                        # [B, L] int32
        ng_e = jnp.take(fused["ngram_emb_p"][i], jnp.asarray(hashes), axis=0)  # [B, L, HP] bf16
        ng_padded.append(jnp.concatenate(
            [ng_e, jnp.zeros((B, S - L, HP), jnp.bfloat16)], axis=1))
    ng_stack = jnp.stack(ng_padded, axis=1)                                   # [B, 6, S, HP] bf16
    return embeds, ng_stack, alphas


def byte_embedding_forward(bytes_input, params, fused, noise_key, H, V):
    embeds, ng_stack, alphas = _prepare_inputs(bytes_input, params, fused, noise_key, H, V)
    # fold the 1/n of `ngram_embeds / n * alpha_n` into one scalar per stage
    alphas_over_n = (alphas / jnp.arange(3, 9, dtype=jnp.float32)).astype(jnp.float32)
    return byte_embedding_pallas(embeds, ng_stack, alphas_over_n, fused, H)


# ---------------------------- pure-JAX reference ------------------------------
def byte_embedding_reference(embeds, ng_stack, alphas, params):
    """Unfused f32 reference mirroring the torch forward (ng_stack is [B,6,S,H])."""
    B, S, H = embeds.shape
    e = embeds
    for i in range(6):
        n = i + 3
        L = S - n + 1
        if L <= 0:
            continue
        gated = (ng_stack[:, i, :L, :] / float(n)) * alphas[i]
        e_head = e[:, :L, :]
        w1e, w1g = params["rg_w1"][i, :H, :], params["rg_w1"][i, H:, :]
        h = e_head @ w1e + gated @ w1g + params["rg_b1"][i]
        mu = h.mean(-1, keepdims=True)
        var = jnp.square(h - mu).mean(-1, keepdims=True)
        h = (h - mu) * jax.lax.rsqrt(var + _LN_EPS) * params["rg_ln_g"][i] + params["rg_ln_b"][i]
        h = 0.5 * h * (1.0 + jnp.tanh(0.7978845608028654 * (h + 0.044715 * h * h * h)))
        logit = (h * params["rg_w2"][i]).sum(-1, keepdims=True) + params["rg_b2"][i]
        r = jax.nn.sigmoid(logit)
        wpe, wpg = params["proj_w"][i, :H, :], params["proj_w"][i, H:, :]
        proj = e_head @ wpe + (gated * r) @ wpg + params["proj_b"][i]
        e = e.at[:, :L, :].set(proj)
    mu = e.mean(-1, keepdims=True)
    var = jnp.square(e - mu).mean(-1, keepdims=True)
    return (e - mu) * jax.lax.rsqrt(var + _LN_EPS) * params["ln_g"] + params["ln_b"]


if __name__ == "__main__":
    H, V = 32, 1024          # hidden_size, ngram_vocab_size
    B, S = 2, 16             # batch, seq_length
    HP = max(128, ((H + 127) // 128) * 128)   # lane-dense (padded) hidden dim

    key = jax.random.PRNGKey(0)
    k_param, k_bytes, k_noise = jax.random.split(key, 3)

    params = init_params(k_param, H, V)
    fused = prepare_fused_params(params, H, HP)          # one-time fusion/padding
    bytes_input = jax.random.randint(k_bytes, (B, S), 0, 256, dtype=jnp.int32)

    out = byte_embedding_forward(bytes_input, params, fused, k_noise, H, V)
    out = jax.block_until_ready(out)
    assert out.shape == (B, S, H) and out.dtype == jnp.float32

    # cross-check against a pure-JAX reference using the same bf16-rounded inputs
    embeds_p, ng_stack_p, alphas = _prepare_inputs(bytes_input, params, fused, k_noise, H, V)
    ref = byte_embedding_reference(embeds_p[..., :H].astype(jnp.float32),
                                   ng_stack_p[..., :H].astype(jnp.float32),
                                   alphas, params)
    np.testing.assert_allclose(np.asarray(out), np.asarray(ref), rtol=5e-3, atol=5e-3)

    print("KERNEL_OK")
</pallas_src>

<mosaic_0001>
module attributes {stable_mosaic.version = 11 : i64} {
  func.func @_byte_embedding_kernel(%arg0: i32, %arg1: i32, %arg2: memref<6xf32, #tpu.memory_space<smem>>, %arg3: memref<6xf32, #tpu.memory_space<smem>>, %arg4: memref<1x16x128xbf16, #tpu.memory_space<vmem>>, %arg5: memref<1x1x16x128xbf16, #tpu.memory_space<vmem>>, %arg6: memref<1x128x256xf32, #tpu.memory_space<vmem>>, %arg7: memref<1x128x256xf32, #tpu.memory_space<vmem>>, %arg8: memref<6x128xf32, #tpu.memory_space<vmem>>, %arg9: memref<6x128xf32, #tpu.memory_space<vmem>>, %arg10: memref<6x128xf32, #tpu.memory_space<vmem>>, %arg11: memref<6x128xf32, #tpu.memory_space<vmem>>, %arg12: memref<6x128xf32, #tpu.memory_space<vmem>>, %arg13: memref<1x128xf32, #tpu.memory_space<vmem>>, %arg14: memref<1x128xf32, #tpu.memory_space<vmem>>, %arg15: memref<1x16x128xf32, #tpu.memory_space<vmem>>) attributes {dimension_semantics = [#tpu.dimension_semantics<parallel>, #tpu.dimension_semantics<arbitrary>], iteration_bounds = array<i64: 2, 6>, scalar_prefetch = 0 : i64, scratch_operands = 0 : i64, tpu.core_type = #tpu.core_type<tc>, window_params = [{transform_indices = @transform_0, window_bounds = array<i64: 6>}, {transform_indices = @transform_1, window_bounds = array<i64: 6>}, {transform_indices = @transform_2, window_bounds = array<i64: 1, 16, 128>}, {transform_indices = @transform_3, window_bounds = array<i64: 1, 1, 16, 128>}, {transform_indices = @transform_4, window_bounds = array<i64: 1, 128, 256>}, {transform_indices = @transform_5, window_bounds = array<i64: 1, 128, 256>}, {pipeline_mode = #tpu.pipeline_mode<synchronous>, transform_indices = @transform_6, window_bounds = array<i64: 6, 128>}, {pipeline_mode = #tpu.pipeline_mode<synchronous>, transform_indices = @transform_7, window_bounds = array<i64: 6, 128>}, {pipeline_mode = #tpu.pipeline_mode<synchronous>, transform_indices = @transform_8, window_bounds = array<i64: 6, 128>}, {pipeline_mode = #tpu.pipeline_mode<synchronous>, transform_indices = @transform_9, window_bounds = array<i64: 6, 128>}, {pipeline_mode = #tpu.pipeline_mode<synchronous>, transform_indices = @transform_10, window_bounds = array<i64: 6, 128>}, {pipeline_mode = #tpu.pipeline_mode<synchronous>, transform_indices = @transform_11, window_bounds = array<i64: 1, 128>}, {pipeline_mode = #tpu.pipeline_mode<synchronous>, transform_indices = @transform_12, window_bounds = array<i64: 1, 128>}, {transform_indices = @transform_13, window_bounds = array<i64: 1, 16, 128>}]} {
    %0 = tpu.iota {dimensions = array<i32: 1>} : vector<1x128xi32>
    %c32_i32 = arith.constant 32 : i32
    %1 = vector.broadcast %c32_i32 : i32 to vector<1x128xi32>
    %2 = arith.cmpi slt, %0, %1 : vector<1x128xi32>
    %3 = arith.extui %2 : vector<1x128xi1> to vector<1x128xi32>
    %4 = arith.sitofp %3 : vector<1x128xi32> to vector<1x128xf32>
    %5 = tpu.iota {dimensions = array<i32: 1>} : vector<1x16x1xi32>
    %c0_i32 = arith.constant 0 : i32
    %6 = arith.cmpi eq, %arg1, %c0_i32 : i32
    %7 = arith.extui %6 : i1 to i32
    %c0_i32_0 = arith.constant 0 : i32
    %8 = arith.cmpi ne, %7, %c0_i32_0 : i32
    scf.if %8 {
      %c0_34 = arith.constant 0 : index
      %c0_35 = arith.constant 0 : index
      %c0_36 = arith.constant 0 : index
      %120 = vector.load %arg4[%c0_34, %c0_35, %c0_36] : memref<1x16x128xbf16, #tpu.memory_space<vmem>>, vector<1x16x128xbf16>
      %121 = arith.extf %120 : vector<1x16x128xbf16> to vector<1x16x128xf32>
      %c0_37 = arith.constant 0 : index
      %c0_38 = arith.constant 0 : index
      %c0_39 = arith.constant 0 : index
      %122 = vector.load %arg15[%c0_37, %c0_38, %c0_39] : memref<1x16x128xf32, #tpu.memory_space<vmem>>, vector<1x16x128xf32>
      tpu.vector_store %arg15[%c0_37, %c0_38, %c0_39], %121 {strides = array<i32>} : memref<1x16x128xf32, #tpu.memory_space<vmem>>, vector<1x16x128xf32>,
    } else {
    }
    %c0 = arith.constant 0 : index
    %c0_1 = arith.constant 0 : index
    %c0_2 = arith.constant 0 : index
    %9 = vector.load %arg15[%c0, %c0_1, %c0_2] : memref<1x16x128xf32, #tpu.memory_space<vmem>>, vector<1x16x128xf32>
    %10 = vector.shape_cast %9 : vector<1x16x128xf32> to vector<16x128xf32>
    %c0_3 = arith.constant 0 : index
    %c0_4 = arith.constant 0 : index
    %c0_5 = arith.constant 0 : index
    %c0_6 = arith.constant 0 : index
    %11 = vector.load %arg5[%c0_3, %c0_4, %c0_5, %c0_6] : memref<1x1x16x128xbf16, #tpu.memory_space<vmem>>, vector<1x1x16x128xbf16>
    %12 = vector.shape_cast %11 : vector<1x1x16x128xbf16> to vector<1x16x128xbf16>
    %13 = arith.extf %12 : vector<1x16x128xbf16> to vector<1x16x128xf32>
    %14 = arith.index_cast %arg1 : i32 to index
    %15 = memref.load %arg2[%14] : memref<6xf32, #tpu.memory_space<smem>>
    %16 = vector.broadcast %15 : f32 to vector<1x16x128xf32>
    %17 = arith.mulf %13, %16 : vector<1x16x128xf32>
    %18 = vector.shape_cast %17 : vector<1x16x128xf32> to vector<16x128xf32>
    %c0_7 = arith.constant 0 : index
    %c0_8 = arith.constant 0 : index
    %c0_9 = arith.constant 0 : index
    %19 = vector.load %arg6[%c0_7, %c0_8, %c0_9] : memref<1x128x256xf32, #tpu.memory_space<vmem>>, vector<1x128x256xf32>
    %20 = vector.shape_cast %19 : vector<1x128x256xf32> to vector<128x256xf32>
    %cst = arith.constant dense<0.000000e+00> : vector<16x256xf32>
    %21 = tpu.matmul %10, %20, %cst {dimension_numbers = #tpu.dot_dimension_numbers<[1], [0], [0], [1], [0, 0, 1, 1], [], []>} : vector<16x128xf32>, vector<128x256xf32>, vector<16x256xf32> -> vector<16x256xf32>
    %c0_10 = arith.constant 0 : index
    %c0_11 = arith.constant 0 : index
    %c0_12 = arith.constant 0 : index
    %22 = vector.load %arg7[%c0_10, %c0_11, %c0_12] : memref<1x128x256xf32, #tpu.memory_space<vmem>>, vector<1x128x256xf32>
    %23 = vector.shape_cast %22 : vector<1x128x256xf32> to vector<128x256xf32>
    %cst_13 = arith.constant dense<0.000000e+00> : vector<16x256xf32>
    %24 = tpu.matmul %18, %23, %cst_13 {dimension_numbers = #tpu.dot_dimension_numbers<[1], [0], [0], [1], [0, 0, 1, 1], [], []>} : vector<16x128xf32>, vector<128x256xf32>, vector<16x256xf32> -> vector<16x256xf32>
    %25 = vector.extract_strided_slice %21 {offsets = [0, 0], sizes = [16, 128], strides = [1, 1]} : vector<16x256xf32> to vector<16x128xf32>
    %26 = vector.extract_strided_slice %24 {offsets = [0, 0], sizes = [16, 128], strides = [1, 1]} : vector<16x256xf32> to vector<16x128xf32>
    %27 = arith.addf %25, %26 : vector<16x128xf32>
    %28 = arith.index_cast %arg1 : i32 to index
    %c0_14 = arith.constant 0 : index
    %29 = vector.load %arg8[%28, %c0_14] : memref<6x128xf32, #tpu.memory_space<vmem>>, vector<1x128xf32>
    %30 = vector.shape_cast %29 : vector<1x128xf32> to vector<128xf32>
    %31 = vector.shape_cast %30 : vector<128xf32> to vector<1x128xf32>
    %32 = vector.broadcast %31 : vector<1x128xf32> to vector<16x128xf32>
    %33 = arith.addf %27, %32 : vector<16x128xf32>
    %cst_15 = arith.constant dense<0.000000e+00> : vector<16xf32>
    %34 = vector.multi_reduction <add>, %33, %cst_15 [1] : vector<16x128xf32> to vector<16xf32>
    %35 = vector.shape_cast %34 : vector<16xf32> to vector<16x1xf32>
    %cst_16 = arith.constant 3.125000e-02 : f32
    %36 = vector.broadcast %cst_16 : f32 to vector<16x1xf32>
    %37 = arith.mulf %35, %36 : vector<16x1xf32>
    %38 = vector.broadcast %37 : vector<16x1xf32> to vector<16x128xf32>
    %39 = arith.subf %33, %38 : vector<16x128xf32>
    %40 = vector.broadcast %4 : vector<1x128xf32> to vector<16x128xf32>
    %41 = arith.mulf %39, %40 : vector<16x128xf32>
    %42 = arith.mulf %41, %41 : vector<16x128xf32>
    %cst_17 = arith.constant dense<0.000000e+00> : vector<16xf32>
    %43 = vector.multi_reduction <add>, %42, %cst_17 [1] : vector<16x128xf32> to vector<16xf32>
    %44 = vector.shape_cast %43 : vector<16xf32> to vector<16x1xf32>
    %cst_18 = arith.constant 3.125000e-02 : f32
    %45 = vector.broadcast %cst_18 : f32 to vector<16x1xf32>
    %46 = arith.mulf %44, %45 : vector<16x1xf32>
    %cst_19 = arith.constant 9.99999974E-6 : f32
    %47 = vector.broadcast %cst_19 : f32 to vector<16x1xf32>
    %48 = arith.addf %46, %47 : vector<16x1xf32>
    %49 = math.rsqrt %48 : vector<16x1xf32>
    %50 = vector.broadcast %49 : vector<16x1xf32> to vector<16x128xf32>
    %51 = arith.mulf %41, %50 : vector<16x128xf32>
    %52 = arith.index_cast %arg1 : i32 to index
    %c0_20 = arith.constant 0 : index
    %53 = vector.load %arg9[%52, %c0_20] : memref<6x128xf32, #tpu.memory_space<vmem>>, vector<1x128xf32>
    %54 = vector.shape_cast %53 : vector<1x128xf32> to vector<128xf32>
    %55 = vector.shape_cast %54 : vector<128xf32> to vector<1x128xf32>
    %56 = vector.broadcast %55 : vector<1x128xf32> to vector<16x128xf32>
    %57 = arith.mulf %51, %56 : vector<16x128xf32>
    %58 = arith.index_cast %arg1 : i32 to index
    %c0_21 = arith.constant 0 : index
    %59 = vector.load %arg10[%58, %c0_21] : memref<6x128xf32, #tpu.memory_space<vmem>>, vector<1x128xf32>
    %60 = vector.shape_cast %59 : vector<1x128xf32> to vector<128xf32>
    %61 = vector.shape_cast %60 : vector<128xf32> to vector<1x128xf32>
    %62 = vector.broadcast %61 : vector<1x128xf32> to vector<16x128xf32>
    %63 = arith.addf %57, %62 : vector<16x128xf32>
    %cst_22 = arith.constant 5.000000e-01 : f32
    %64 = vector.broadcast %cst_22 : f32 to vector<16x128xf32>
    %65 = arith.mulf %64, %63 : vector<16x128xf32>
    %cst_23 = arith.constant 4.471500e-02 : f32
    %66 = vector.broadcast %cst_23 : f32 to vector<16x128xf32>
    %67 = arith.mulf %66, %63 : vector<16x128xf32>
    %68 = arith.mulf %67, %63 : vector<16x128xf32>
    %69 = arith.mulf %68, %63 : vector<16x128xf32>
    %70 = arith.addf %63, %69 : vector<16x128xf32>
    %cst_24 = arith.constant 0.797884583 : f32
    %71 = vector.broadcast %cst_24 : f32 to vector<16x128xf32>
    %72 = arith.mulf %71, %70 : vector<16x128xf32>
    %73 = math.tanh %72 : vector<16x128xf32>
    %cst_25 = arith.constant 1.000000e+00 : f32
    %74 = vector.broadcast %cst_25 : f32 to vector<16x128xf32>
    %75 = arith.addf %74, %73 : vector<16x128xf32>
    %76 = arith.mulf %65, %75 : vector<16x128xf32>
    %77 = arith.index_cast %arg1 : i32 to index
    %c0_26 = arith.constant 0 : index
    %78 = vector.load %arg11[%77, %c0_26] : memref<6x128xf32, #tpu.memory_space<vmem>>, vector<1x128xf32>
    %79 = vector.shape_cast %78 : vector<1x128xf32> to vector<128xf32>
    %80 = vector.shape_cast %79 : vector<128xf32> to vector<1x128xf32>
    %81 = vector.broadcast %80 : vector<1x128xf32> to vector<16x128xf32>
    %82 = arith.mulf %76, %81 : vector<16x128xf32>
    %cst_27 = arith.constant dense<0.000000e+00> : vector<16xf32>
    %83 = vector.multi_reduction <add>, %82, %cst_27 [1] : vector<16x128xf32> to vector<16xf32>
    %84 = vector.shape_cast %83 : vector<16xf32> to vector<16x1xf32>
    %85 = arith.index_cast %arg1 : i32 to index
    %86 = memref.load %arg3[%85] : memref<6xf32, #tpu.memory_space<smem>>
    %87 = vector.broadcast %86 : f32 to vector<16x1xf32>
    %88 = arith.addf %84, %87 : vector<16x1xf32>
    %cst_28 = arith.constant 0.000000e+00 : f32
    %89 = vector.broadcast %cst_28 : f32 to vector<16x1xf32>
    %90 = arith.subf %89, %88 : vector<16x1xf32>
    %91 = math.exp %90 : vector<16x1xf32>
    %cst_29 = arith.constant 1.000000e+00 : f32
    %92 = vector.broadcast %cst_29 : f32 to vector<16x1xf32>
    %93 = arith.addf %92, %91 : vector<16x1xf32>
    %94 = tpu.reciprocal %93 {approx = true} : vector<16x1xf32> -> vector<16x1xf32>
    %95 = vector.extract_strided_slice %21 {offsets = [0, 128], sizes = [16, 128], strides = [1, 1]} : vector<16x256xf32> to vector<16x128xf32>
    %96 = vector.extract_strided_slice %24 {offsets = [0, 128], sizes = [16, 128], strides = [1, 1]} : vector<16x256xf32> to vector<16x128xf32>
    %97 = vector.broadcast %94 : vector<16x1xf32> to vector<16x128xf32>
    %98 = arith.mulf %97, %96 : vector<16x128xf32>
    %99 = arith.addf %95, %98 : vector<16x128xf32>
    %100 = arith.index_cast %arg1 : i32 to index
    %c0_30 = arith.constant 0 : index
    %101 = vector.load %arg12[%100, %c0_30] : memref<6x128xf32, #tpu.memory_space<vmem>>, vector<1x128xf32>
    %102 = vector.shape_cast %101 : vector<1x128xf32> to vector<128xf32>
    %103 = vector.shape_cast %102 : vector<128xf32> to vector<1x128xf32>
    %104 = vector.broadcast %103 : vector<1x128xf32> to vector<16x128xf32>
    %105 = arith.addf %99, %104 : vector<16x128xf32>
    %106 = vector.shape_cast %105 : vector<16x128xf32> to vector<1x16x128xf32>
    %c16_i32 = arith.constant 16 : i32
    %107 = arith.subi %c16_i32, %arg1 : i32
    %c2_i32 = arith.constant 2 : i32
    %108 = arith.subi %107, %c2_i32 : i32
    %109 = vector.broadcast %108 : i32 to vector<1x16x1xi32>
    %110 = arith.cmpi slt, %5, %109 : vector<1x16x1xi32>
    %111 = vector.shape_cast %110 : vector<1x16x1xi1> to vector<1x16x1xi1>
    %112 = vector.broadcast %111 : vector<1x16x1xi1> to vector<1x16x128xi1>
    %113 = arith.select %112, %106, %9 : vector<1x16x128xi1>, vector<1x16x128xf32>
    %c5_i32 = arith.constant 5 : i32
    %114 = arith.cmpi slt, %arg1, %c5_i32 : i32
    %115 = arith.extui %114 : i1 to i32
    %c0_i32_31 = arith.constant 0 : i32
    %116 = arith.cmpi ne, %115, %c0_i32_31 : i32
    scf.if %116 {
      %c0_34 = arith.constant 0 : index
      %c0_35 = arith.constant 0 : index
      %c0_36 = arith.constant 0 : index
      %120 = vector.load %arg15[%c0_34, %c0_35, %c0_36] : memref<1x16x128xf32, #tpu.memory_space<vmem>>, vector<1x16x128xf32>
      tpu.vector_store %arg15[%c0_34, %c0_35, %c0_36], %113 {strides = array<i32>} : memref<1x16x128xf32, #tpu.memory_space<vmem>>, vector<1x16x128xf32>,
    } else {
    }
    %c5_i32_32 = arith.constant 5 : i32
    %117 = arith.cmpi eq, %arg1, %c5_i32_32 : i32
    %118 = arith.extui %117 : i1 to i32
    %c0_i32_33 = arith.constant 0 : i32
    %119 = arith.cmpi ne, %118, %c0_i32_33 : i32
    scf.if %119 {
      %cst_34 = arith.constant dense<0.000000e+00> : vector<1x16xf32>
      %120 = vector.multi_reduction <add>, %113, %cst_34 [2] : vector<1x16x128xf32> to vector<1x16xf32>
      %121 = vector.shape_cast %120 : vector<1x16xf32> to vector<1x16x1xf32>
      %cst_35 = arith.constant 3.125000e-02 : f32
      %122 = vector.broadcast %cst_35 : f32 to vector<1x16x1xf32>
      %123 = arith.mulf %121, %122 : vector<1x16x1xf32>
      %124 = vector.broadcast %123 : vector<1x16x1xf32> to vector<1x16x128xf32>
      %125 = arith.subf %113, %124 : vector<1x16x128xf32>
      %126 = vector.shape_cast %4 : vector<1x128xf32> to vector<1x1x128xf32>
      %127 = vector.broadcast %126 : vector<1x1x128xf32> to vector<1x16x128xf32>
      %128 = arith.mulf %125, %127 : vector<1x16x128xf32>
      %129 = arith.mulf %128, %128 : vector<1x16x128xf32>
      %cst_36 = arith.constant dense<0.000000e+00> : vector<1x16xf32>
      %130 = vector.multi_reduction <add>, %129, %cst_36 [2] : vector<1x16x128xf32> to vector<1x16xf32>
      %131 = vector.shape_cast %130 : vector<1x16xf32> to vector<1x16x1xf32>
      %cst_37 = arith.constant 3.125000e-02 : f32
      %132 = vector.broadcast %cst_37 : f32 to vector<1x16x1xf32>
      %133 = arith.mulf %131, %132 : vector<1x16x1xf32>
      %cst_38 = arith.constant 9.99999974E-6 : f32
      %134 = vector.broadcast %cst_38 : f32 to vector<1x16x1xf32>
      %135 = arith.addf %133, %134 : vector<1x16x1xf32>
      %136 = math.rsqrt %135 : vector<1x16x1xf32>
      %137 = vector.broadcast %136 : vector<1x16x1xf32> to vector<1x16x128xf32>
      %138 = arith.mulf %128, %137 : vector<1x16x128xf32>
      %c0_39 = arith.constant 0 : index
      %c0_40 = arith.constant 0 : index
      %139 = vector.load %arg13[%c0_39, %c0_40] : memref<1x128xf32, #tpu.memory_space<vmem>>, vector<1x128xf32>
      %140 = vector.shape_cast %139 : vector<1x128xf32> to vector<1x1x128xf32>
      %141 = vector.broadcast %140 : vector<1x1x128xf32> to vector<1x16x128xf32>
      %142 = arith.mulf %138, %141 : vector<1x16x128xf32>
      %c0_41 = arith.constant 0 : index
      %c0_42 = arith.constant 0 : index
      %143 = vector.load %arg14[%c0_41, %c0_42] : memref<1x128xf32, #tpu.memory_space<vmem>>, vector<1x128xf32>
      %144 = vector.shape_cast %143 : vector<1x128xf32> to vector<1x1x128xf32>
      %145 = vector.broadcast %144 : vector<1x1x128xf32> to vector<1x16x128xf32>
      %146 = arith.addf %142, %145 : vector<1x16x128xf32>
      %c0_43 = arith.constant 0 : index
      %c0_44 = arith.constant 0 : index
      %c0_45 = arith.constant 0 : index
      %147 = vector.load %arg15[%c0_43, %c0_44, %c0_45] : memref<1x16x128xf32, #tpu.memory_space<vmem>>, vector<1x16x128xf32>
      tpu.vector_store %arg15[%c0_43, %c0_44, %c0_45], %146 {strides = array<i32>} : memref<1x16x128xf32, #tpu.memory_space<vmem>>, vector<1x16x128xf32>,
    } else {
    }
    return
  }
  func.func @transform_0(%arg0: i32, %arg1: i32) -> i32 {
    %c0_i32 = arith.constant 0 : i32
    %c0_i32_0 = arith.constant 0 : i32
    return %c0_i32 : i32
  }
  func.func @transform_1(%arg0: i32, %arg1: i32) -> i32 {
    %c0_i32 = arith.constant 0 : i32
    %c0_i32_0 = arith.constant 0 : i32
    return %c0_i32 : i32
  }
  func.func @transform_2(%arg0: i32, %arg1: i32) -> (i32, i32, i32) {
    %c0_i32 = arith.constant 0 : i32
    %c0_i32_0 = arith.constant 0 : i32
    %c0_i32_1 = arith.constant 0 : i32
    return %arg0, %c0_i32, %c0_i32_0 : i32, i32, i32
  }
  func.func @transform_3(%arg0: i32, %arg1: i32) -> (i32, i32, i32, i32) {
    %c0_i32 = arith.constant 0 : i32
    %c0_i32_0 = arith.constant 0 : i32
    %c0_i32_1 = arith.constant 0 : i32
    return %arg0, %arg1, %c0_i32, %c0_i32_0 : i32, i32, i32, i32
  }
  func.func @transform_4(%arg0: i32, %arg1: i32) -> (i32, i32, i32) {
    %c0_i32 = arith.constant 0 : i32
    %c0_i32_0 = arith.constant 0 : i32
    %c0_i32_1 = arith.constant 0 : i32
    return %arg1, %c0_i32, %c0_i32_0 : i32, i32, i32
  }
  func.func @transform_5(%arg0: i32, %arg1: i32) -> (i32, i32, i32) {
    %c0_i32 = arith.constant 0 : i32
    %c0_i32_0 = arith.constant 0 : i32
    %c0_i32_1 = arith.constant 0 : i32
    return %arg1, %c0_i32, %c0_i32_0 : i32, i32, i32
  }
  func.func @transform_6(%arg0: i32, %arg1: i32) -> (i32, i32) {
    %c0_i32 = arith.constant 0 : i32
    %c0_i32_0 = arith.constant 0 : i32
    %c0_i32_1 = arith.constant 0 : i32
    return %c0_i32, %c0_i32_0 : i32, i32
  }
  func.func @transform_7(%arg0: i32, %arg1: i32) -> (i32, i32) {
    %c0_i32 = arith.constant 0 : i32
    %c0_i32_0 = arith.constant 0 : i32
    %c0_i32_1 = arith.constant 0 : i32
    return %c0_i32, %c0_i32_0 : i32, i32
  }
  func.func @transform_8(%arg0: i32, %arg1: i32) -> (i32, i32) {
    %c0_i32 = arith.constant 0 : i32
    %c0_i32_0 = arith.constant 0 : i32
    %c0_i32_1 = arith.constant 0 : i32
    return %c0_i32, %c0_i32_0 : i32, i32
  }
  func.func @transform_9(%arg0: i32, %arg1: i32) -> (i32, i32) {
    %c0_i32 = arith.constant 0 : i32
    %c0_i32_0 = arith.constant 0 : i32
    %c0_i32_1 = arith.constant 0 : i32
    return %c0_i32, %c0_i32_0 : i32, i32
  }
  func.func @transform_10(%arg0: i32, %arg1: i32) -> (i32, i32) {
    %c0_i32 = arith.constant 0 : i32
    %c0_i32_0 = arith.constant 0 : i32
    %c0_i32_1 = arith.constant 0 : i32
    return %c0_i32, %c0_i32_0 : i32, i32
  }
  func.func @transform_11(%arg0: i32, %arg1: i32) -> (i32, i32) {
    %c0_i32 = arith.constant 0 : i32
    %c0_i32_0 = arith.constant 0 : i32
    %c0_i32_1 = arith.constant 0 : i32
    return %c0_i32, %c0_i32_0 : i32, i32
  }
  func.func @transform_12(%arg0: i32, %arg1: i32) -> (i32, i32) {
    %c0_i32 = arith.constant 0 : i32
    %c0_i32_0 = arith.constant 0 : i32
    %c0_i32_1 = arith.constant 0 : i32
    return %c0_i32, %c0_i32_0 : i32, i32
  }
  func.func @transform_13(%arg0: i32, %arg1: i32) -> (i32, i32, i32) {
    %c0_i32 = arith.constant 0 : i32
    %c0_i32_0 = arith.constant 0 : i32
    %c0_i32_1 = arith.constant 0 : i32
    return %arg0, %c0_i32, %c0_i32_0 : i32, i32, i32
  }
}

</mosaic_0001>

<bundles_post_ra>
// kernel: tpu_custom_call.1
= control target key start
LH: loop header
LB: loop body
LE: loop exit
PB: predicated region body
PF: predicated region fallthrough
CT: control target
= control target key end

     0   :  { %s2640_s0 = inlined_call_operand.hbm [shape: f32[6], index: 0, kind: input, shape index: {}]   ;;  %s2641_s1 = inlined_call_operand.hbm [shape: f32[6], index: 1, kind: input, shape index: {}]   ;;  %s2642_s2 = inlined_call_operand.hbm [shape: bf16[2,16,128], index: 2, kind: input, shape index: {}]   ;;  %s2643_s3 = inlined_call_operand.hbm [shape: bf16[2,6,16,128], index: 3, kind: input, shape index: {}]   ;;  %s2644_s4 = inlined_call_operand.hbm [shape: f32[6,128,256], index: 4, kind: input, shape index: {}]   ;;  %s2645_s5 = inlined_call_operand.hbm [shape: f32[6,128,256], index: 5, kind: input, shape index: {}]   ;;  %s2646_s6 = inlined_call_operand.hbm [shape: f32[6,128], index: 6, kind: input, shape index: {}]   ;;  %s2647_s7 = inlined_call_operand.hbm [shape: f32[6,128], index: 7, kind: input, shape index: {}]   ;;  %s2648_s8 = inlined_call_operand.hbm [shape: f32[6,128], index: 8, kind: input, shape index: {}]   ;;  %s2649_s9 = inlined_call_operand.vmem [shape: f32[6,128], index: 9, kind: input, shape index: {}]   ;;  %s2650_s10 = inlined_call_operand.hbm [shape: f32[6,128], index: 10, kind: input, shape index: {}]   ;;  %s2651_s11 = inlined_call_operand.vmem [shape: f32[1,128], index: 11, kind: input, shape index: {}]   ;;  %s2652_s12 = inlined_call_operand.vmem [shape: f32[1,128], index: 12, kind: input, shape index: {}]   ;;  %s2653_s13 = inlined_call_operand.hbm [shape: f32[2,16,128], index: 13, kind: output, shape index: {}]  }
   0x1   :  { %2670 = sst [smem:[#allocation45_spill]] %s2640_s0 }
   0x2   :  { %2671 = sst [smem:[#allocation46_spill]] %s2641_s1 }
   0x3   :  { %2672 = sst [smem:[#allocation47_spill]] %s2642_s2 }
   0x4   :  { %2673 = sst [smem:[#allocation48_spill]] %s2643_s3 }
   0x5   :  { %2674 = sst [smem:[#allocation49_spill]] %s2644_s4 }
   0x6   :  { %2675 = sst [smem:[#allocation50_spill]] %s2645_s5 }
   0x7   :  { %2676 = sst [smem:[#allocation51_spill]] %s2646_s6 }
   0x8   :  { %2677 = sst [smem:[#allocation52_spill]] %s2647_s7 }
   0x9   :  { %2678 = sst [smem:[#allocation53_spill]] %s2648_s8 }
   0xa   :  { %2679 = sst [smem:[#allocation54_spill]] %s2649_s9 }
   0xb   :  { %2680 = sst [smem:[#allocation55_spill]] %s2650_s10 }
   0xc   :  { %2681 = sst [smem:[#allocation56_spill]] %s2651_s11 }
   0xd   :  { %2682 = sst [smem:[#allocation57_spill]] %s2652_s12 }
   0xe   :  { %2683 = sst [smem:[#allocation58_spill]] %s2653_s13 }
   0xf   :  { %18 = vsyncpa [#allocation5], 0 }
  0x10   :  { %19 = vsyncpa [#allocation7], 0 }
  0x11   :  { %20 = vsyncpa [#allocation3], 0 }
  0x12   :  { %22 = vsyncpa [#allocation3 + $0x1], 0 }
  0x13   :  { %23 = vsyncpa [#allocation10], 0 }
  0x14   :  { %25 = vsyncpa [#allocation10 + $0x1], 0 }
  0x15   :  { %26 = vsyncpa [#allocation13], 0 }
  0x16   :  { %28 = vsyncpa [#allocation13 + $0x1], 0 }
  0x17   :  { %29 = vsyncpa [#allocation16], 0 }
  0x18   :  { %30 = vsyncpa [#allocation19], 0 }
  0x19   :  { %31 = vsyncpa [#allocation4], 0 }
  0x1a   :  { %33 = vsyncpa [#allocation4 + $0x1], 0  ;;  %s2113_s25 = smov 0   ;;  %s2115_s26 = smov 0  }
  0x1b   :  { %s2117_s27 = smov 0   ;;  %s2119_s28 = smov 0  }
  0x1c   :  { %s2121_s29 = smov 0   ;;  %s2123_s30 = smov 0  }
  0x1d   :  { %s2125_s14 = smov 0   ;;  %s2127_s15 = smov 0  }
  0x1e   :  { %s2129_s16 = smov 0   ;;  %s2131_s17 = smov 0  }
  0x1f   :  { %s2133_s18 = smov 0   ;;  %s2135_s19 = smov 0  }
  0x20   :  { %s2137_s20 = smov 0   ;;  %s2139_s21 = smov 0  }
  0x21 LB: > { %2684 = sst [smem:[#allocation31_spill]] %s1976_s25  ;;  %s2187_s13 = sadd.s32 4294967295, %s2028_s21   ;;  %s2028_s21 = sphi %s2139_s21, %s39_s21   ;;  %s2024_s20 = sphi %s2137_s20, %s2746_s20   ;;  %s2020_s19 = sphi %s2135_s19, %s2745_s19   ;;  %s2016_s18 = sphi %s2133_s18, %s2744_s18   ;;  %s2012_s17 = sphi %s2131_s17, %s2743_s17   ;;  %s2008_s16 = sphi %s2129_s16, %s2742_s16   ;;  %s2004_s15 = sphi %s2127_s15, %s2752_s15   ;;  %s2000_s14 = sphi %s2125_s14, %s2751_s14   ;;  %s1996_s30 = sphi %s2123_s30, %s2750_s30   ;;  %s1992_s29 = sphi %s2121_s29, %s2749_s29   ;;  %s1988_s28 = sphi %s2119_s28, %s2739_s28   ;;  %s1984_s27 = sphi %s2117_s27, %s2748_s27   ;;  %s1980_s26 = sphi %s2115_s26, %s2747_s26   ;;  %s1976_s25 = sphi %s2113_s25, %s2738_s25  }
  0x22   : > { %2685 = sst [smem:[#allocation32_spill]] %s1980_s26  ;;  %p1290_p0 = scmp.ge.s32.totalorder %s2028_s21, 1 }
  0x23   : > { %2686 = sst [smem:[#allocation33_spill]] %s1992_s29  ;;  %p114_p1 = scmp.eq.s32.totalorder %s2187_s13, 0 }
  0x24   : > { %2687 = sst [smem:[#allocation34_spill]] %s2008_s16  ;;  %p377_p2 = scmp.lt.s32.totalorder %s2028_s21, 13 }
  0x25   : > { %2688 = sst [smem:[#allocation35_spill]] %s2012_s17  ;;  %s2030_s22 = smov [#allocation14]  }
  0x26   : > { %2689 = sst [smem:[#allocation36_spill]] %s2016_s18  ;;  %p2192_p3 = pnand %p1290_p0, %p377_p2 }
  0x27   : > { %2690 = sst [smem:[#allocation37_spill]] %s2020_s19  ;;  %s411_s23 = sshll.u32 %s2030_s22, 4  ;;  %s412_s23 = int_to_ptr.vmem [resolvable:$true] %s411_s23 }
  0x28   : > { %2691 = sst [smem:[#allocation38_spill]] %s2024_s20  ;;  %p1378_p4 = pneg %p2192_p3 }
  0x29   : > { %s2692_s6 = sld [smem:[#allocation51_spill]]  ;;  %s2031_s22 = smov [#allocation15]  }
  0x2a   : > { %s2693_s18 = scalar_select %p2192_p3, 1, 0 }
  0x2b   : > { %s2695_s7 = sld [smem:[#allocation52_spill]]  ;;  %p2203_p5 = pnand %p1378_p4, %p114_p1 }
  0x2c   : > { %2694 = sst [smem:[#allocation39_spill]] %s2693_s18  ;;  %s423_s17 = sshll.u32 %s2031_s22, 4  ;;  %s424_s17 = int_to_ptr.vmem [resolvable:$true] %s423_s17 }
  0x2d   : > { %s51_s12 = sadd.s32 1, %s2024_s20  ;;  %p108_p7 = scmp.eq.s32.totalorder %s2028_s21, 0 }
  0x2e   : > { %p135_p8 = scmp.ne.s32.totalorder %s1996_s30, %s1992_s29  ;;  %p141_p11 = scmp.ne.s32.totalorder %s1992_s29, %s1988_s28 }
  0x2f   : > { %s409_s24 = sshll.u32 %s2692_s6, 4  ;;  %s48_s6 = sadd.s32 1, %s2020_s19  ;;  %s410_s24 = int_to_ptr.hbm [resolvable:$true] %s409_s24 }
  0x30   : > { %1387 = dma.hbm_to_vmem [thread:$0]  (!%p2203_p5), %s410_s24, 128, %s412_s23, [#allocation13]  }
  0x31   : > { %s421_s11 = sshll.u32 %s2695_s7, 4  ;;  %p49_p6 = scmp.ge.s32.totalorder %s48_s6, 6  ;;  %s422_s11 = int_to_ptr.hbm [resolvable:$true] %s421_s11 }
  0x32   : > { %1390 = dma.hbm_to_vmem [thread:$0]  (!%p2203_p5), %s422_s11, 128, %s424_s17, [#allocation16]  }
  0x33   : > { %s128_s7 = sadd.s32 1, %s1996_s30  ;;  %s2754_s6 = smov (%p49_p6, %s48_s6), 0 }
  0x34   : > { %2697 = sst [smem:[#allocation40_spill]] %s2754_s6  ;;  %s2756_s12 = smov (!%p49_p6, %s51_s12), %s2024_s20 }
  0x35   : > { %s2222_s22 = ssub.s32 %s2020_s19, %s2754_s6  ;;  %p2226_p9 = por %p135_p8, %p108_p7 }
  0x36   : > { %2698 = sst [smem:[#allocation41_spill]] %s2222_s22  ;;  %p53_p10 = scmp.ge.s32.totalorder %s2756_s12, 2 }
  0x37   : > { %p152_p12 = scmp.eq.s32.totalorder %s2222_s22, 0  ;;  %p1420_p13 = scmp.lt.s32.totalorder %s2028_s21, 12 }
  0x38   : > { %s2758_s12 = smov (%p53_p10, %s2756_s12), 0  ;;  %p2238_p0 = por %p141_p11, %p114_p1 }
  0x39   : > { %2700 = sst [smem:[#allocation42_spill]] %s2758_s12  ;;  %s2244_s24 = ssub.s32 %s2024_s20, %s2758_s12 }
  0x3a   : > { %s2701_s17 = scalar_select %p2238_p0, 1, 0 }
  0x3b   : > { %p98_p2 = scmp.eq.s32.totalorder %s2244_s24, 0  ;;  %s125_s23 = sor.u32 %s2222_s22, %s2244_s24 }
  0x3c   : > { %2702 = sst [smem:[#allocation43_spill]] %s2701_s17  ;;  %p126_p4 = scmp.eq.s32.totalorder %s125_s23, 0 }
  0x3d   : > { %s491_s6 = sand.u32 1, %s1996_s30   ;;  %s1302_s5 = sshll.u32 %s2020_s19, 1 }
  0x3e   : > { %s2252_s29 = scalar_select %p126_p4, %s1996_s30, %s128_s7  }
  0x3f   : > { %s1301_s18 = sshll.u32 %s491_s6, 3  ;;  %s1343_s4 = smul.u32 12, %s2024_s20 }
  0x40   : > { %s493_s2 = scalar_lea.vmem [#allocation9], %s1301_s18  ;;  %p1401_p6 = pnand %p1420_p13, %p2226_p9 }
  0x41   : > { %s503_s25 = sshll.u32 %s493_s2, 4  ;;  %s498_s12 = sadd.s32 %s1343_s4, %s1302_s5  ;;  %s504_s25 = int_to_ptr.vmem [resolvable:$true] %s503_s25 }
  0x42   : > { %s1303_s17 = sshll.u32 %s498_s12, 2  ;;  %s2703_s3 = sld [smem:[#allocation48_spill]] }
  0x43   : > { %s2704_s7 = sand.u32 1, %s2028_s21   ;;  %s2665_s18 = smov 64  }
  0x44   : > { %s2265_s6 = scalar_lea.sflag [#allocation10], %s2704_s7  ;;  %s2666_s2 = smov 4  }
  0x45   : > { %s2705_s0 = sld [smem:[#allocation45_spill]]  ;;  %s2035_s23 = smov [#allocation6]  }
  0x46   : > { %s2706_s1 = sld [smem:[#allocation46_spill]]  ;;  %s2036_s4 = smov [#allocation17]  }
  0x47   : > { %s2707_s8 = sld [smem:[#allocation53_spill]]  ;;  %s435_s5 = sshll.u32 %s2036_s4, 4  ;;  %s436_s5 = int_to_ptr.vmem [resolvable:$true] %s435_s5 }
  0x48   : > { %s500_s28 = scalar_lea.hbm %s2703_s3, %s1303_s17  ;;  %s2708_s10 = sld [smem:[#allocation55_spill]] }
  0x49   : > { %s501_s26 = sshll.u32 %s500_s28, 4  ;;  %s2034_s28 = smov [#allocation2]   ;;  %s502_s26 = int_to_ptr.hbm [resolvable:$true] %s501_s26 }
  0x4a   : > { %1403 = dma.hbm_to_vmem [thread:$0]  (!%p1401_p6), %s502_s26, 128, %s504_s25, %s2265_s6, %s2665_s18, %s2665_s18, %s2666_s2  }
  0x4b   : > { %s389_s12 = sshll.u32 %s2705_s0, 4  ;;  %s100_s25 = sadd.s32 1, %s2008_s16  ;;  %s390_s12 = int_to_ptr.hbm [resolvable:$true] %s389_s12 }
  0x4c   : > { %s399_s17 = sshll.u32 %s2706_s1, 4  ;;  %p107_p8 = scmp.ne.s32.totalorder %s2008_s16, %s2004_s15  ;;  %s400_s17 = int_to_ptr.hbm [resolvable:$true] %s399_s17 }
  0x4d   : > { %1381 = dma.hbm_to_smem (!%p2203_p5), %s390_s12, 16, %s2034_s28, [#allocation5]  }
  0x4e   : > { %1384 = dma.hbm_to_smem (!%p2203_p5), %s400_s17, 16, %s2035_s23, [#allocation7]  }
  0x4f   : > { %s433_s7 = sshll.u32 %s2707_s8, 4  ;;  %s448_s11 = sshll.u32 %s2708_s10, 4  ;;  %s434_s7 = int_to_ptr.hbm [resolvable:$true] %s433_s7  ;;  %s449_s11 = int_to_ptr.hbm [resolvable:$true] %s448_s11 }
  0x50   : > { %1393 = dma.hbm_to_vmem [thread:$0]  (!%p2203_p5), %s434_s7, 128, %s436_s5, [#allocation16]  }
  0x51   : > { %s2037_s17 = smov [#allocation18]   ;;  %s1289_s23 = sadd.s32 4294967294, %s2028_s21  }
  0x52   : > { %s450_s28 = sshll.u32 %s2037_s17, 4  ;;  %p113_p9 = scmp.ne.s32.totalorder %s2004_s15, %s2000_s14  ;;  %s451_s28 = int_to_ptr.vmem [resolvable:$true] %s450_s28 }
  0x53   : > { %1396 = dma.hbm_to_vmem [thread:$0]  (!%p2203_p5), %s449_s11, 128, %s451_s28, [#allocation19]  }
  0x54   : > { %s2296_s26 = scalar_select %p98_p2, %s2008_s16, %s100_s25  }
  0x55   : > { %p364_p10 = scmp.eq.s32.totalorder %s2187_s13, 11  ;;  %p370_p11 = scmp.eq.s32.totalorder %s1289_s23, 11 }
  0x56   : > { %2709 = sst [smem:[#allocation44_spill]] %s2296_s26  ;;  %p2305_p4 = por %p108_p7, %p107_p8 }
  0x57   : > { %p2311_p6 = por %p114_p1, %p113_p9  ;;  %s2712_s24 = sld [smem:[#allocation32_spill]] }
  0x58   : > { %p2315_p5 = por %p364_p10, %p107_p8  ;;  %p2319_p2 = por %p370_p11, %p113_p9 }
  0x59   : > { %s467_s22 = sand.u32 1, %s2008_s16   ;;  %s2716_s11 = sld [smem:[#allocation31_spill]] }
  0x5a   : > { %s2715_s12 = scalar_select %p2319_p2, 1, 0 }
  0x5b   : > { %s1331_s17 = sshll.u32 %s2024_s20, 3  ;;  %s1298_s28 = sshll.u32 %s467_s22, 3 }
  0x5c   : > { %s2717_s18 = sld [smem:[#allocation47_spill]]  ;;  %s471_s1 = scalar_lea.vmem [#allocation8], %s1298_s28 }
  0x5d   : > { %s479_s3 = sshll.u32 %s471_s1, 4  ;;  %p1398_p8 = pnand %p1420_p13, %p2305_p4  ;;  %s480_s3 = int_to_ptr.vmem [resolvable:$true] %s479_s3 }
  0x5e   : > { %s468_s8 = scalar_lea.sflag [#allocation3], %s467_s22  ;;  %s2718_s10 = smov 4  }
  0x5f   : > { %s2719_s26 = smov 64   ;;  %s154_s20 = sadd.s32 1, %s1984_s27 }
  0x60   : > { %p161_p9 = scmp.ne.s32.totalorder %s1984_s27, %s2712_s24  ;;  %p167_p11 = scmp.ne.s32.totalorder %s2712_s24, %s2716_s11 }
  0x61   : > { %s2341_s23 = scalar_select %p152_p12, %s1984_s27, %s154_s20  }
  0x62   : > { %s476_s2 = scalar_lea.hbm %s2717_s18, %s1331_s17  ;;  %p163_p10 = por %p161_p9, %p108_p7 }
  0x63   : > { %s477_s0 = sshll.u32 %s476_s2, 4  ;;  %s515_s1 = sand.u32 1, %s1984_s27   ;;  %s478_s0 = int_to_ptr.hbm [resolvable:$true] %s477_s0 }
  0x64   : > { %1400 = dma.hbm_to_vmem [thread:$0]  (!%p1398_p8), %s478_s0, 128, %s480_s3, %s468_s8, %s2719_s26, %s2719_s26, %s2718_s10  }
  0x65   : > { %s1332_s18 = sshll.u32 %s2020_s19, 8  ;;  %p2351_p2 = por %p167_p11, %p114_p1 }
  0x66   : > { %s1304_s7 = sshll.u32 %s515_s1, 8  ;;  %s2721_s3 = sld [smem:[#allocation49_spill]] }
  0x67   : > { %s517_s20 = scalar_lea.vmem [#allocation11], %s1304_s7  ;;  %p1404_p7 = pnand %p1420_p13, %p163_p10 }
  0x68   : > { %s525_s26 = sshll.u32 %s517_s20, 4  ;;  %s2722_s11 = sld [smem:[#allocation50_spill]]  ;;  %s526_s26 = int_to_ptr.vmem [resolvable:$true] %s525_s26 }
  0x69   : > { %s2038_s28 = smov 256   ;;  %s2039_s25 = smov 16  }
  0x6a   : > { %s539_s19 = scalar_lea.vmem [#allocation12], %s1304_s7  ;;  %s2723_s22 = sand.u32 1, %s2028_s21  }
  0x6b   : > { %s547_s16 = sshll.u32 %s539_s19, 4  ;;  %s536_s0 = scalar_lea.sflag [#allocation13], %s2723_s22  ;;  %s548_s16 = int_to_ptr.vmem [resolvable:$true] %s547_s16 }
  0x6c   : > { %s522_s8 = scalar_lea.hbm %s2721_s3, %s1332_s18 }
  0x6d   : > { %s523_s10 = sshll.u32 %s522_s8, 4  ;;  %559 = sbr.rel (%p2192_p3) target bundleno = 1095 (0x447), region = 72  ;;  %s524_s10 = int_to_ptr.hbm [resolvable:$true] %s523_s10 }
  0x6e   : > { %s544_s17 = scalar_lea.hbm %s2722_s11, %s1332_s18 }
  0x6f   : > { %1406 = dma.hbm_to_vmem [thread:$0]  (!%p1404_p7), %s524_s10, 4096, %s526_s26, %s2265_s6, %s2038_s28, %s2038_s28, %s2039_s25  }
  0x70   : > { %s545_s1 = sshll.u32 %s544_s17, 4  ;;  %s546_s1 = int_to_ptr.hbm [resolvable:$true] %s545_s1 }
  0x71   : > { %1409 = dma.hbm_to_vmem [thread:$0]  (!%p1404_p7), %s546_s1, 4096, %s548_s16, %s536_s0, %s2038_s28, %s2038_s28, %s2039_s25  }
  0x72   : > { %1935 = dma.done.wait (%p114_p1), [#allocation5], 16  }
  0x73   : > { %1937 = vsyncadd (%p114_p1), [#allocation5], 4294967280 }
  0x74   : > { %1939 = dma.done.wait (%p114_p1), [#allocation7], 16  }
  0x75   : > { %1941 = vsyncadd (%p114_p1), [#allocation7], 4294967280  ;;  %s2377_s19 = sand.u32 1, %s2004_s15  }
  0x76   : > { %s1313_s16 = sshll.u32 %s2377_s19, 3  ;;  %s572_s6 = scalar_lea.sflag [#allocation3], %s2377_s19 }
  0x77   : > { %s2381_s18 = scalar_lea.vmem [#allocation8], %s1313_s16 }
  0x78   : > { %1943 = dma.done.wait (%p2311_p6), %s572_s6, 128  }
  0x79   : > { %1945 = vsyncadd (%p2311_p6), %s572_s6, 4294967168  ;;  %s2725_s7 = sld [smem:[#allocation33_spill]]  ;;  %s581_s10 = sand.u32 1, %s2187_s13  }
  0x7a   : > { %s582_s24 = scalar_lea.sflag [#allocation10], %s581_s10 }
  0x7f   : > { %s583_s20 = sand.u32 1, %s2725_s7  }
  0x80   : > { %s2389_s26 = sshll.u32 %s583_s20, 3 }
  0x81   : > { %s585_s5 = scalar_lea.vmem [#allocation9], %s2389_s26 }
  0x82   : > { %1947 = dma.done.wait (%p2238_p0), %s582_s24, 128  }
  0x83   : > { %1949 = vsyncadd (%p2238_p0), %s582_s24, 4294967168  ;;  %s2727_s11 = sld [smem:[#allocation32_spill]] }
  0x89   : > { %s593_s17 = sand.u32 1, %s2727_s11  }
  0x8a   : > { %s1315_s9 = sshll.u32 %s593_s17, 8 }
  0x8b   : > { %s2397_s28 = scalar_lea.vmem [#allocation11], %s1315_s9 }
  0x8c   : > { %1951 = dma.done.wait (%p2351_p2), %s582_s24, 4096  }
  0x8d   : > { %1953 = vsyncadd (%p2351_p2), %s582_s24, 4294963200  ;;  %s602_s25 = scalar_lea.sflag [#allocation13], %s581_s10  ;;  %s2403_s1 = scalar_lea.vmem [#allocation12], %s1315_s9 }
  0x8e   : > { %1955 = dma.done.wait (%p2351_p2), %s602_s25, 4096  }
  0x8f   : > { %1957 = vsyncadd (%p2351_p2), %s602_s25, 4294963200 }
  0x90   : > { %1959 = dma.done.wait (%p114_p1), [#allocation13], 128  }
  0x91   : > { %1961 = vsyncadd (%p114_p1), [#allocation13], 4294967168 }
  0x92   : > { %1963 = dma.done.wait (%p114_p1), [#allocation16], 256  }
  0x93   : > { %1965 = vsyncadd (%p114_p1), [#allocation16], 4294967040 }
  0x94   : > { %1967 = dma.done.wait (%p114_p1), [#allocation19], 128  }
  0x95   : > { %1969 = vsyncadd (%p114_p1), [#allocation19], 4294967168 }
  0x96   : > { %631 = sfence }
  0x97   : > { %s1321_s2 = sshll.u32 %s2377_s19, 4  ;;  %v685_v0 = vlaneseq  ;;  %v2040_v4 = vmov 0.0   ;;  %s2728_s0 = sld [smem:[#allocation35_spill]] }
  0x98   : > { %s2429_s22 = scalar_lea.vmem [#allocation20], %s1321_s2 }
  0x99   : > { %v686_v1 = vand.u32 127, %v685_v0  ;;  %v2422_v2 = vshrl.u32 %v685_v0, 7 }
  0x9b   : > { %vm687_vm0 = vcmp.lt.s32.totalorder %v686_v1, 32  ;;  %v2425_v3 = vadd.s32 8, %v2422_v2 }
  0x9c   : > { %v2427_v5 = vsel %vm687_vm0, 1.0, %v2040_v4 }
  0x9d   : > { %p1323_p3 = scmp.ne.s32.totalorder %s2728_s0, 0 }
  0x9f   : > { %696 = sbr.rel (%p1323_p3) target bundleno = 169 (0xa9), region = 116 }
  0xa4   : > { %v1336_v6 = vld [vmem:[%s2381_s18] sm:$0xff]  }
  0xa5   : > { %v1337_v7 = vunpack.c.l.bf16 %v1336_v6  ;;  %v1338_v8 = vunpack.c.h.bf16 %v1336_v6 }
  0xa7   : > { %701 = vst [vmem:[%s2429_s22] sm:$0xff] %v1337_v7 }
  0xa8   : > { %702 = vst [vmem:[%s2429_s22 + $0x8] sm:$0xff] %v1338_v8 }
  0xa9 PF: > { %v821_v9 = vld [vmem:[%s2403_s1 + $0xf0] sm:$0xff]  ;;  %v819_v10 = vld [vmem:[%s2403_s1 + $0xe0] sm:$0xff]  ;;  %s2729_s13 = sld [smem:[#allocation35_spill]]  ;;  %v822_v7 = vld [vmem:[%s2403_s1 + $0xf8] sm:$0xff] }
  0xaa   : > { %823 = vmatpush.msra.mxu2 %v821_v9  ;;  %v743_v11 = vld [vmem:[%s2397_s28 + $0xf0] sm:$0xff]  ;;  %v741_v12 = vld [vmem:[%s2397_s28 + $0xe0] sm:$0xff]  ;;  %s2730_s10 = sld [smem:[#allocation54_spill]]  ;;  %846 = vmatpush.msra.mxu3 %v822_v7  ;;  %v820_v8 = vld [vmem:[%s2403_s1 + $0xe8] sm:$0xff] }
  0xab   : > { %v817_v13 = vld [vmem:[%s2403_s1 + $0xd0] sm:$0xff]  ;;  %745 = vmatpush.msra.mxu0 %v743_v11  ;;  %v815_v15 = vld [vmem:[%s2403_s1 + $0xc0] sm:$0xff]  ;;  %v818_v9 = vld [vmem:[%s2403_s1 + $0xd8] sm:$0xff] }
  0xac   : > { %824 = vmatpush.msra.mxu2 %v819_v10  ;;  %v739_v14 = vld [vmem:[%s2397_s28 + $0xd0] sm:$0xff]  ;;  %v737_v16 = vld [vmem:[%s2397_s28 + $0xc0] sm:$0xff]  ;;  %847 = vmatpush.msra.mxu3 %v820_v8  ;;  %v816_v11 = vld [vmem:[%s2403_s1 + $0xc8] sm:$0xff] }
  0xad   : > { %746 = vmatpush.msra.mxu0 %v741_v12  ;;  %v813_v17 = vld [vmem:[%s2403_s1 + $0xb0] sm:$0xff]  ;;  %v811_v19 = vld [vmem:[%s2403_s1 + $0xa0] sm:$0xff]  ;;  %v714_v8 = vld [vmem:[%s2397_s28 + $0x8] sm:$0xff] }
  0xae   : > { %825 = vmatpush.msra.mxu2 %v817_v13  ;;  %v735_v18 = vld [vmem:[%s2397_s28 + $0xb0] sm:$0xff]  ;;  %v733_v20 = vld [vmem:[%s2397_s28 + $0xa0] sm:$0xff]  ;;  %848 = vmatpush.msra.mxu3 %v818_v9  ;;  %v744_v13 = vld [vmem:[%s2397_s28 + $0xf8] sm:$0xff] }
  0xaf   : > { %747 = vmatpush.msra.mxu0 %v739_v14  ;;  %v809_v21 = vld [vmem:[%s2403_s1 + $0x90] sm:$0xff]  ;;  %v807_v23 = vld [vmem:[%s2403_s1 + $0x80] sm:$0xff]  ;;  %s2456_s3 = sld [smem:[#allocation2 + %s2729_s13]]  ;;  %s871_s16 = scalar_lea.vmem [#allocation14], %s2729_s13  ;;  %v2484_v48 = vld [vmem:[%s2429_s22 + $0x8] sm:$0xff]  ;;  %768 = vmatpush.msra.mxu1 %v744_v13 }
  0xb0   : > { %826 = vmatpush.msra.mxu2 %v815_v15  ;;  %v731_v22 = vld [vmem:[%s2397_s28 + $0x90] sm:$0xff]  ;;  %v729_v24 = vld [vmem:[%s2397_s28 + $0x80] sm:$0xff]  ;;  %v1553_v50 = vld [vmem:[%s871_s16] ss:$0 sm:$0xff]  ;;  %s918_s6 = scalar_lea.vmem [#allocation15], %s2729_s13  ;;  %s923_s18 = scalar_lea.vmem [#allocation17], %s2729_s13  ;;  %849 = vmatpush.msra.mxu3 %v816_v11 }
  0xb1   : > { %748 = vmatpush.msra.mxu0 %v737_v16  ;;  %v805_v25 = vld [vmem:[%s2403_s1 + $0x70] sm:$0xff]  ;;  %v803_v27 = vld [vmem:[%s2403_s1 + $0x60] sm:$0xff]  ;;  %s946_s20 = scalar_lea.vmem %s2730_s10, %s2729_s13  ;;  %v814_v14 = vld [vmem:[%s2403_s1 + $0xb8] sm:$0xff]  ;;  %s955_s11 = sld [smem:[#allocation6 + %s2729_s13]] }
  0xb2   : > { %827 = vmatpush.msra.mxu2 %v813_v17  ;;  %v727_v26 = vld [vmem:[%s2397_s28 + $0x70] sm:$0xff]  ;;  %v725_v28 = vld [vmem:[%s2397_s28 + $0x60] sm:$0xff]  ;;  %850 = vmatpush.msra.mxu3 %v814_v14  ;;  %v742_v16 = vld [vmem:[%s2397_s28 + $0xe8] sm:$0xff]  ;;  %s978_s17 = ssub.s32 14, %s2729_s13  ;;  %p1324_p1 = scmp.ge.s32.totalorder %s2729_s13, 5 }
  0xb3   : > { %749 = vmatpush.msra.mxu0 %v735_v18  ;;  %v801_v29 = vld [vmem:[%s2403_s1 + $0x50] sm:$0xff]  ;;  %v799_v31 = vld [vmem:[%s2403_s1 + $0x40] sm:$0xff]  ;;  %v812_v17 = vld [vmem:[%s2403_s1 + $0xa8] sm:$0xff]  ;;  %769 = vmatpush.msra.mxu1 %v742_v16 }
  0xb4   : > { %828 = vmatpush.msra.mxu2 %v811_v19  ;;  %v723_v30 = vld [vmem:[%s2397_s28 + $0x50] sm:$0xff]  ;;  %v721_v32 = vld [vmem:[%s2397_s28 + $0x40] sm:$0xff]  ;;  %v740_v18 = vld [vmem:[%s2397_s28 + $0xd8] sm:$0xff]  ;;  %851 = vmatpush.msra.mxu3 %v812_v17 }
  0xb5   : > { %750 = vmatpush.msra.mxu0 %v733_v20  ;;  %v1340_v33 = vld [vmem:[%s585_s5] sm:$0xff]   ;;  %v795_v36 = vld [vmem:[%s2403_s1 + $0x20] sm:$0xff]  ;;  %v710_v38 = vstv %s2456_s3  ;;  %v738_v20 = vld [vmem:[%s2397_s28 + $0xc8] sm:$0xff]  ;;  %770 = vmatpush.msra.mxu1 %v740_v18  ;;  %s973_s5 = scalar_lea.vmem [#allocation18], %s2729_s13 }
  0xb6   : > { %829 = vmatpush.msra.mxu2 %v809_v21  ;;  %v797_v34 = vld [vmem:[%s2403_s1 + $0x30] sm:$0xff]  ;;  %v1341_v37 = vunpack.c.l.bf16 %v1340_v33  ;;  %v717_v39 = vld [vmem:[%s2397_s28 + $0x20] sm:$0xff]  ;;  %v1342_v46 = vunpack.c.h.bf16 %v1340_v33  ;;  %v810_v19 = vld [vmem:[%s2403_s1 + $0x98] sm:$0xff] }
  0xb7   : > { %751 = vmatpush.msra.mxu0 %v731_v22  ;;  %v719_v35 = vld [vmem:[%s2397_s28 + $0x30] sm:$0xff]  ;;  %v791_v42 = vld [vmem:[%s2403_s1] sm:$0xff]  ;;  %v808_v21 = vld [vmem:[%s2403_s1 + $0x88] sm:$0xff]  ;;  %852 = vmatpush.msra.mxu3 %v810_v19 }
  0xb8   : > { %830 = vmatpush.msra.mxu2 %v807_v23  ;;  %v793_v40 = vld [vmem:[%s2403_s1 + $0x10] sm:$0xff]  ;;  %v2472_v43 = vmul.f32 %v1341_v37, %v710_v38  ;;  %v713_v44 = vld [vmem:[%s2397_s28] sm:$0xff]  ;;  %v2480_v47 = vmul.f32 %v1342_v46, %v710_v38  ;;  %v736_v23 = vld [vmem:[%s2397_s28 + $0xb8] sm:$0xff]  ;;  %771 = vmatpush.msra.mxu1 %v738_v20 }
  0xb9   : > { %752 = vmatpush.msra.mxu0 %v729_v24  ;;  %v715_v41 = vld [vmem:[%s2397_s28 + $0x10] sm:$0xff]  ;;  %v806_v24 = vld [vmem:[%s2403_s1 + $0x78] sm:$0xff]  ;;  %853 = vmatpush.msra.mxu3 %v808_v21  ;;  %v796_v46 = vld [vmem:[%s2403_s1 + $0x28] sm:$0xff] }
  0xba   : > { %831 = vmatpush.msra.mxu2 %v805_v25  ;;  %v2476_v45 = vld [vmem:[%s2429_s22] sm:$0xff]  ;;  %772 = vmatpush.msra.mxu1 %v736_v23  ;;  %v728_v37 = vld [vmem:[%s2397_s28 + $0x78] sm:$0xff] }
  0xbb   : > { %753 = vmatpush.msra.mxu0 %v727_v26  ;;  %v734_v26 = vld [vmem:[%s2397_s28 + $0xa8] sm:$0xff]  ;;  %854 = vmatpush.msra.mxu3 %v806_v24  ;;  %v798_v38 = vld [vmem:[%s2403_s1 + $0x38] sm:$0xff] }
  0xbc   : > { %832 = vmatpush.msra.mxu2 %v803_v27  ;;  %v804_v27 = vld [vmem:[%s2403_s1 + $0x68] sm:$0xff]  ;;  %773 = vmatpush.msra.mxu1 %v734_v26 }
  0xbd   : > { %754 = vmatpush.msra.mxu0 %v725_v28  ;;  %855 = vmatpush.msra.mxu3 %v804_v27 }
  0xbe   : > { %833 = vmatpush.msra.mxu2 %v801_v29 }
  0xbf   : > { %755 = vmatpush.msra.mxu0 %v723_v30 }
  0xc0   : > { %834 = vmatpush.msra.mxu2 %v799_v31  ;;  %v732_v31 = vld [vmem:[%s2397_s28 + $0x98] sm:$0xff] }
  0xc1   : > { %756 = vmatpush.msra.mxu0 %v721_v32  ;;  %v802_v32 = vld [vmem:[%s2403_s1 + $0x58] sm:$0xff]  ;;  %774 = vmatpush.msra.mxu1 %v732_v31 }
  0xc2   : > { %835 = vmatpush.msra.mxu2 %v797_v34  ;;  %v730_v34 = vld [vmem:[%s2397_s28 + $0x88] sm:$0xff]  ;;  %856 = vmatpush.msra.mxu3 %v802_v32 }
  0xc3   : > { %757 = vmatpush.msra.mxu0 %v719_v35  ;;  %v800_v35 = vld [vmem:[%s2403_s1 + $0x48] sm:$0xff]  ;;  %775 = vmatpush.msra.mxu1 %v730_v34 }
  0xc4   : > { %836 = vmatpush.msra.mxu2 %v795_v36  ;;  %857 = vmatpush.msra.mxu3 %v800_v35 }
  0xc5   : > { %758 = vmatpush.msra.mxu0 %v717_v39  ;;  %776 = vmatpush.msra.mxu1 %v728_v37 }
  0xc6   : > { %837 = vmatpush.msra.mxu2 %v793_v40  ;;  %858 = vmatpush.msra.mxu3 %v798_v38 }
  0xc7   : > { %759 = vmatpush.msra.mxu0 %v715_v41 }
  0xc8   : > { %838 = vmatpush.msra.mxu2 %v791_v42  ;;  %859 = vmatpush.msra.mxu3 %v796_v46 }
  0xc9   : > { %839 = vmatmul.f32.vlgmr.msra.gmra.mxu2 %v2472_v43  ;;  %760 = vmatpush.msra.mxu0 %v713_v44  ;;  %v726_v44 = vld [vmem:[%s2397_s28 + $0x68] sm:$0xff] }
  0xca   : > { %761 = vmatmul.f32.vlgmr.msra.gmra.mxu0 %v2476_v45  ;;  %777 = vmatpush.msra.mxu1 %v726_v44 }
  0xd1   : > { %842 = vmatmul.f32.gmra.mxu2 %v2480_v47 }
  0xd2   : > { %764 = vmatmul.f32.gmra.mxu0 %v2484_v48 }
 0x147   : > { %v762_v49 = vpop.f32.mrf.mxu0 }
 0x14c   : > { %v840_v51 = vpop.f32.mrf.mxu2 }
 0x14d   : > { %v869_v52 = vadd.f32 %v840_v51, %v762_v49  ;;  %v724_v49 = vld [vmem:[%s2397_s28 + $0x58] sm:$0xff] }
 0x14e   : > { %v794_v51 = vld [vmem:[%s2403_s1 + $0x18] sm:$0xff]  ;;  %778 = vmatpush.msra.mxu1 %v724_v49 }
 0x14f   : > { %v874_v53 = vadd.f32 %v1553_v50, %v869_v52  ;;  %v765_v54 = vpop.f32.mrf.mxu0  ;;  %860 = vmatpush.msra.mxu3 %v794_v51  ;;  %v979_v51 = vstv %s978_s17 }
 0x150   : > { %vm980_vm7 = vcmp.lt.s32.totalorder %v2422_v2, %v979_v51  ;;  %vm981_vm8 = vcmp.lt.s32.totalorder %v2425_v3, %v979_v51 }
 0x151   : > { %876 = vadd.xlane.f32.xlu0 %v874_v53 }
 0x154   : > { %v843_v55 = vpop.f32.mrf.mxu2 }
 0x155   : > { %v870_v56 = vadd.f32 %v843_v55, %v765_v54  ;;  %v722_v54 = vld [vmem:[%s2397_s28 + $0x48] sm:$0xff] }
 0x156   : > { %v792_v55 = vld [vmem:[%s2403_s1 + $0x8] sm:$0xff]  ;;  %779 = vmatpush.msra.mxu1 %v722_v54 }
 0x157   : > { %v875_v57 = vadd.f32 %v1553_v50, %v870_v56  ;;  %v1554_v50 = vld [vmem:[%s918_s6] ss:$0 sm:$0xff]  ;;  %861 = vmatpush.msra.mxu3 %v792_v55 }
 0x158   : > { %v1555_v56 = vld [vmem:[%s923_s18] ss:$0 sm:$0xff]  ;;  %862 = vmatmul.f32.vlgmr.msra.gmra.mxu3 %v2472_v43 }
 0x159   : > { %878 = vadd.xlane.f32.xlu0 %v875_v57 }
 0x160   : > { %865 = vmatmul.f32.gmra.mxu3 %v2480_v47  ;;  %v1556_v47 = vld [vmem:[%s946_s20] ss:$0 sm:$0xff] }
 0x1c4   : > { %v877_v58 = vpop.xlane.xlu0 %876 }
 0x1c5   : > { %v880_v59 = vmul.f32 0.03125, %v877_v58 }
 0x1c7   : > { %v882_v60 = vsub.f32 %v874_v53, %v880_v59  ;;  %v720_v59 = vld [vmem:[%s2397_s28 + $0x38] sm:$0xff] }
 0x1c8   : > { %780 = vmatpush.msra.mxu1 %v720_v59 }
 0x1c9   : > { %v2491_v61 = vmul.f32 %v2427_v5, %v882_v60 }
 0x1cb   : > { %v886_v62 = vmul.f32 %v2491_v61, %v2491_v61 }
 0x1cc   : > { %v879_v63 = vpop.xlane.xlu0 %878 }
 0x1cd   : > { %v881_v0 = vmul.f32 0.03125, %v879_v63  ;;  %888 = vadd.xlane.f32.xlu1 %v886_v62 }
 0x1cf   : > { %v883_v1 = vsub.f32 %v875_v57, %v881_v0 }
 0x1d1   : > { %v2496_v4 = vmul.f32 %v2427_v5, %v883_v1  ;;  %v718_v1 = vld [vmem:[%s2397_s28 + $0x28] sm:$0xff] }
 0x1d2   : > { %781 = vmatpush.msra.mxu1 %v718_v1 }
 0x1d3   : > { %v887_v6 = vmul.f32 %v2496_v4, %v2496_v4 }
 0x1d5   : > { %890 = vadd.xlane.f32.xlu1 %v887_v6  ;;  %v716_v6 = vld [vmem:[%s2397_s28 + $0x18] sm:$0xff] }
 0x1d6   : > { %782 = vmatpush.msra.mxu1 %v716_v6 }
 0x1d8   : > { %783 = vmatpush.msra.mxu1 %v714_v8 }
 0x1d9   : > { %784 = vmatmul.f32.vlgmr.msra.gmra.mxu1 %v2476_v45 }
 0x1e1   : > { %787 = vmatmul.f32.gmra.mxu1 %v2484_v48 }
 0x240   : > { %v889_v10 = vpop.xlane.xlu1 %888 }
 0x241   : > { %v892_v12 = vmul.f32 0.03125, %v889_v10 }
 0x243   : > { %v894_v15 = vadd.f32 1e-05, %v892_v12 }
 0x245   : > { %1558 = vrsqrt.f32 %v894_v15  ;;  %vm902_vm2 = vweird.f32 %v894_v15 }
 0x248   : > { %v891_v22 = vpop.xlane.xlu1 %890 }
 0x249   : > { %v893_v25 = vmul.f32 0.03125, %v891_v22 }
 0x24b   : > { %v1559_v28 = vpop.eup %1558  ;;  %v895_v29 = vadd.f32 1e-05, %v893_v25 }
 0x24c   : > { %v897_v30 = vmul.f32 %v1559_v28, %v894_v15  ;;  %vm903_vm1 = vweird.f32 %v1559_v28 }
 0x24d   : > { %1560 = vrsqrt.f32 %v895_v29  ;;  %vm904_vm3 = vmor %vm902_vm2, %vm903_vm1  ;;  %vm912_vm5 = vweird.f32 %v895_v29 }
 0x24e   : > { %v898_v33 = vmul.f32 %v1559_v28, %v897_v30 }
 0x250   : > { %v899_v36 = vmul.f32 0.5, %v898_v33 }
 0x252   : > { %v900_v39 = vsub.f32 1.5, %v899_v36 }
 0x253   : > { %v1561_v40 = vpop.eup %1560 }
 0x254   : > { %v901_v41 = vmul.f32 %v1559_v28, %v900_v39  ;;  %v907_v42 = vmul.f32 %v1561_v40, %v895_v29  ;;  %vm913_vm4 = vweird.f32 %v1561_v40  ;;  %v956_v29 = vstv %s955_s11 }
 0x255   : > { %vm914_vm6 = vmor %vm912_vm5, %vm913_vm4 }
 0x256   : > { %v905_v52 = vsel %vm904_vm3, %v1559_v28, %v901_v41  ;;  %v908_v53 = vmul.f32 %v1561_v40, %v907_v42  ;;  %v785_v41 = vpop.f32.mrf.mxu1 }
 0x257   : > { %v916_v57 = vmul.f32 %v905_v52, %v2491_v61 }
 0x258   : > { %v909_v58 = vmul.f32 0.5, %v908_v53 }
 0x259   : > { %v921_v60 = vmul.f32 %v1554_v50, %v916_v57 }
 0x25a   : > { %v910_v62 = vsub.f32 1.5, %v909_v58 }
 0x25b   : > { %v926_v63 = vadd.f32 %v1555_v56, %v921_v60 }
 0x25c   : > { %v911_v0 = vmul.f32 %v1561_v40, %v910_v62 }
 0x25d   : > { %v930_v61 = vmul.f32 0.044715, %v926_v63  ;;  %v928_v20 = vmul.f32 0.5, %v926_v63 }
 0x25e   : > { %v915_v7 = vsel %vm914_vm6, %v1561_v40, %v911_v0  ;;  %v863_v40 = vpop.f32.mrf.mxu3  ;;  %v788_v57 = vpop.f32.mrf.mxu1 }
 0x25f   : > { %v917_v9 = vmul.f32 %v915_v7, %v2496_v4  ;;  %v932_v10 = vmul.f32 %v930_v61, %v926_v63 }
 0x261   : > { %v922_v11 = vmul.f32 %v1554_v50, %v917_v9  ;;  %v934_v12 = vmul.f32 %v932_v10, %v926_v63  ;;  %v1557_v50 = vld [vmem:[%s973_s5] ss:$0 sm:$0xff] }
 0x263   : > { %v927_v43 = vadd.f32 %v1555_v56, %v922_v11  ;;  %v936_v13 = vadd.f32 %v934_v12, %v926_v63 }
 0x265   : > { %v938_v14 = vmul.f32 0.7978846, %v936_v13  ;;  %v931_v15 = vmul.f32 0.044715, %v927_v43  ;;  %v929_v25 = vmul.f32 0.5, %v927_v43 }
 0x266   : > { %v866_v54 = vpop.f32.mrf.mxu3 }
 0x267   : > { %1562 = vtanh.f32 %v938_v14  ;;  %v933_v16 = vmul.f32 %v931_v15, %v927_v43 }
 0x269   : > { %v935_v17 = vmul.f32 %v933_v16, %v927_v43 }
 0x26b   : > { %v937_v4 = vadd.f32 %v935_v17, %v927_v43 }
 0x26d   : > { %v1563_v18 = vpop.eup %1562  ;;  %v939_v19 = vmul.f32 0.7978846, %v937_v4 }
 0x26e   : > { %v942_v21 = vadd.f32 1.0, %v1563_v18 }
 0x26f   : > { %1564 = vtanh.f32 %v939_v19 }
 0x270   : > { %v944_v22 = vmul.f32 %v942_v21, %v928_v20 }
 0x272   : > { %v949_v23 = vmul.f32 %v1556_v47, %v944_v22 }
 0x274   : > { %951 = vadd.xlane.f32.xlu2 %v949_v23 }
 0x275   : > { %v1565_v24 = vpop.eup %1564 }
 0x276   : > { %v943_v26 = vadd.f32 1.0, %v1565_v24 }
 0x278   : > { %v945_v27 = vmul.f32 %v943_v26, %v929_v25 }
 0x27a   : > { %v950_v28 = vmul.f32 %v1556_v47, %v945_v27 }
 0x27c   : > { %953 = vadd.xlane.f32.xlu2 %v950_v28 }
 0x2e7   : > { %v952_v30 = vpop.xlane.xlu2 %951 }
 0x2e8   : > { %v957_v31 = vadd.f32 %v956_v29, %v952_v30 }
 0x2ea   : > { %v959_v32 = vsub.f32 0.0, %v957_v31 }
 0x2ec   : > { %v961_v33 = vmul.f32 1.442695, %v959_v32 }
 0x2ee   : > { %1566 = vpow2.f32 %v961_v33 }
 0x2ef   : > { %v954_v34 = vpop.xlane.xlu2 %953 }
 0x2f0   : > { %v958_v35 = vadd.f32 %v956_v29, %v954_v34 }
 0x2f2   : > { %v960_v36 = vsub.f32 0.0, %v958_v35 }
 0x2f4   : > { %v1567_v37 = vpop.eup %1566  ;;  %v963_v38 = vmul.f32 1.442695, %v960_v36 }
 0x2f5   : > { %v965_v39 = vadd.f32 1.0, %v1567_v37 }
 0x2f6   : > { %1568 = vpow2.f32 %v963_v38 }
 0x2f7   : > { %1570 = vrcp.f32 %v965_v39 }
 0x2fc   : > { %v1569_v42 = vpop.eup %1568 }
 0x2fd   : > { %v1571_v44 = vpop.eup %1570  ;;  %v966_v46 = vadd.f32 1.0, %v1569_v42 }
 0x2fe   : > { %v969_v49 = vmul.f32 %v1571_v44, %v863_v40 }
 0x2ff   : > { %1572 = vrcp.f32 %v966_v46 }
 0x300   : > { %v971_v52 = vadd.f32 %v969_v49, %v785_v41 }
 0x302   : > { %v976_v53 = vadd.f32 %v1557_v50, %v971_v52 }
 0x304   : > { %v986_v55 = vsel %vm980_vm7, %v976_v53, %v2476_v45 }
 0x305   : > { %v1573_v56 = vpop.eup %1572 }
 0x306   : > { %v970_v58 = vmul.f32 %v1573_v56, %v866_v54 }
 0x308   : > { %v972_v59 = vadd.f32 %v970_v58, %v788_v57  ;;  %991 = sbr.rel (%p1324_p1) target bundleno = 783 (0x30f), region = 120 }
 0x30a   : > { %v977_v60 = vadd.f32 %v1557_v50, %v972_v59 }
 0x30c   : > { %v987_v62 = vsel %vm981_vm8, %v977_v60, %v2484_v48 }
 0x30d   : > { %992 = vst [vmem:[%s2429_s22] sm:$0xff] %v986_v55 }
 0x30e   : > { %993 = vst [vmem:[%s2429_s22 + $0x8] sm:$0xff] %v987_v62 }
 0x30f PF: > { %s2731_s9 = sld [smem:[#allocation35_spill]] }
 0x315   : > { %p1325_p12 = scmp.ne.s32.totalorder %s2731_s9, 5 }
 0x316   : > { %s2732_s1 = sld [smem:[#allocation56_spill]] (!%p1325_p12) }
 0x317   : > { %997 = sbr.rel (%p1325_p12) target bundleno = 1073 (0x431), region = 124  ;;  %s2733_s13 = sld [smem:[#allocation57_spill]] (!%p1325_p12) }
 0x31c   : > { %998 = vadd.xlane.f32.xlu0 %v986_v55  ;;  %v1574_v19 = vld [vmem:[%s2732_s1] ss:$0 sm:$0xff] }
 0x31d   : > { %v1575_v22 = vld [vmem:[%s2733_s13] ss:$0 sm:$0xff] }
 0x324   : > { %1000 = vadd.xlane.f32.xlu0 %v987_v62 }
 0x38f   : > { %v999_v2 = vpop.xlane.xlu0 %998 }
 0x390   : > { %v1002_v45 = vmul.f32 0.03125, %v999_v2 }
 0x392   : > { %v1004_v63 = vsub.f32 %v986_v55, %v1002_v45 }
 0x394   : > { %v1006_v3 = vmul.f32 %v2427_v5, %v1004_v63 }
 0x396   : > { %v1008_v0 = vmul.f32 %v1006_v3, %v1006_v3 }
 0x397   : > { %v1001_v48 = vpop.xlane.xlu0 %1000 }
 0x398   : > { %v1003_v1 = vmul.f32 0.03125, %v1001_v48  ;;  %1010 = vadd.xlane.f32.xlu1 %v1008_v0 }
 0x39a   : > { %v1005_v6 = vsub.f32 %v987_v62, %v1003_v1 }
 0x39c   : > { %v1007_v61 = vmul.f32 %v2427_v5, %v1005_v6 }
 0x39e   : > { %v1009_v7 = vmul.f32 %v1007_v61, %v1007_v61 }
 0x3a0   : > { %1012 = vadd.xlane.f32.xlu1 %v1009_v7 }
 0x40b   : > { %v1011_v8 = vpop.xlane.xlu1 %1010 }
 0x40c   : > { %v1014_v9 = vmul.f32 0.03125, %v1011_v8 }
 0x40e   : > { %v1016_v10 = vadd.f32 1e-05, %v1014_v9 }
 0x410   : > { %1576 = vrsqrt.f32 %v1016_v10  ;;  %vm1024_vm10 = vweird.f32 %v1016_v10 }
 0x413   : > { %v1013_v11 = vpop.xlane.xlu1 %1012 }
 0x414   : > { %v1015_v12 = vmul.f32 0.03125, %v1013_v11 }
 0x416   : > { %v1577_v43 = vpop.eup %1576  ;;  %v1017_v13 = vadd.f32 1e-05, %v1015_v12 }
 0x417   : > { %v1019_v14 = vmul.f32 %v1577_v43, %v1016_v10  ;;  %vm1025_vm9 = vweird.f32 %v1577_v43 }
 0x418   : > { %1578 = vrsqrt.f32 %v1017_v13  ;;  %vm1026_vm11 = vmor %vm1024_vm10, %vm1025_vm9  ;;  %vm1034_vm13 = vweird.f32 %v1017_v13 }
 0x419   : > { %v1020_v15 = vmul.f32 %v1577_v43, %v1019_v14 }
 0x41b   : > { %v1021_v16 = vmul.f32 0.5, %v1020_v15 }
 0x41d   : > { %v1022_v17 = vsub.f32 1.5, %v1021_v16 }
 0x41e   : > { %v1579_v4 = vpop.eup %1578 }
 0x41f   : > { %v1023_v18 = vmul.f32 %v1577_v43, %v1022_v17  ;;  %v1029_v5 = vmul.f32 %v1579_v4, %v1017_v13  ;;  %vm1035_vm12 = vweird.f32 %v1579_v4 }
 0x420   : > { %vm1036_vm14 = vmor %vm1034_vm13, %vm1035_vm12 }
 0x421   : > { %v1027_v20 = vsel %vm1026_vm11, %v1577_v43, %v1023_v18  ;;  %v1030_v21 = vmul.f32 %v1579_v4, %v1029_v5 }
 0x422   : > { %v1038_v47 = vmul.f32 %v1027_v20, %v1006_v3 }
 0x423   : > { %v1031_v23 = vmul.f32 0.5, %v1030_v21 }
 0x424   : > { %v1044_v24 = vmul.f32 %v1574_v19, %v1038_v47 }
 0x425   : > { %v1032_v25 = vsub.f32 1.5, %v1031_v23 }
 0x426   : > { %v1050_v26 = vadd.f32 %v1575_v22, %v1044_v24 }
 0x427   : > { %v1033_v27 = vmul.f32 %v1579_v4, %v1032_v25 }
 0x428   : > { %1052 = vst [vmem:[%s2429_s22] sm:$0xff] %v1050_v26 }
 0x429   : > { %v1037_v28 = vsel %vm1036_vm14, %v1579_v4, %v1033_v27 }
 0x42a   : > { %v1039_v29 = vmul.f32 %v1037_v28, %v1007_v61 }
 0x42c   : > { %v1045_v30 = vmul.f32 %v1574_v19, %v1039_v29 }
 0x42e   : > { %v1051_v31 = vadd.f32 %v1575_v22, %v1045_v30 }
 0x430   : > { %1053 = vst [vmem:[%s2429_s22 + $0x8] sm:$0xff] %v1051_v31 }
 0x431 PF: > { %s2734_s3 = sld [smem:[#allocation36_spill]]  ;;  %s1067_s20 = sshll.u32 %s2429_s22, 4  ;;  %s1068_s20 = int_to_ptr.vmem [resolvable:$true] %s1067_s20 }
 0x432   : > { %s2735_s7 = sld [smem:[#allocation58_spill]]  ;;  %s1055_s24 = scalar_lea.sflag [#allocation4], %s2377_s19 }
 0x437   : > { %s1334_s16 = sshll.u32 %s2734_s3, 4 }
 0x438   : > { %s1066_s8 = scalar_lea.hbm %s2735_s7, %s1334_s16  ;;  %s1870_s28 = scalar_lea.hbm %s2735_s7, 32 }
 0x439   : > { %s1069_s26 = sshll.u32 %s1066_s8, 4  ;;  %s1070_s26 = int_to_ptr.hbm [resolvable:$true] %s1069_s26 }
 0x43a   : > { %s1864_s5 = sshra.s32 %s1070_s26, 4  ;;  %s1865_s5 = int_to_ptr.hbm [resolvable:$true] %s1864_s5 }
 0x43b   : > { %s1866_s11 = scalar_lea.hbm %s1865_s5, 16  ;;  %p1871_p6 = scmp.lt.s32.totalorder %s1865_s5, %s2735_s7 }
 0x43c   : > { %p1867_p13 = scmp.ne.s32.totalorder %s1865_s5, %s1866_s11  ;;  %p1872_p2 = scmp.lt.s32.totalorder %s1870_s28, %s1866_s11 }
 0x43e   : > { %p1868_p0 = pnand %p1867_p13, %p2315_p5  ;;  %p1873_p8 = por %p1872_p2, %p1871_p6 }
 0x440   : > { %p1869_p4 = pneg %p1868_p0 }
 0x442   : > { %p1874_p9 = pnand %p1873_p8, %p1869_p4 }
 0x444   : > { %1877 = shalt.err (!%p1874_p9)
}
 0x445   : > { %s2041_s19 = smov 128   ;;  %s2042_s22 = smov 8  }
 0x446   : > { %1376 = dma.vmem_to_hbm [thread:$0]  (%p2315_p5), %s1068_s20, 256, %s1070_s26, %s1055_s24, %s2041_s19, %s2041_s19, %s2042_s22  }
 0x447 PF: > { %p1427_p10 = scmp.ge.s32.totalorder %s2028_s21, 2  ;;  %s1084_s2 = sand.u32 1, %s2000_s14  }
 0x448   : > { %p2736_p11 = scmp.ne.s32.totalorder %s2715_s12, 0  ;;  %s1085_s0 = scalar_lea.sflag [#allocation4], %s1084_s2 }
 0x44a   : > { %p1411_p7 = pnand %p1427_p10, %p2736_p11 }
 0x44c   : > { %p1412_p3 = pneg %p1411_p7 }
 0x44e   : > { %1971 = dma.done.wait (%p1412_p3), %s1085_s0, 256  }
 0x44f   : > { %1973 = vsyncadd (%p1412_p3), %s1085_s0, 4294967040  ;;  %s39_s21 = sadd.s32 1, %s2028_s21   ;;  %s2738_s25 = sld [smem:[#allocation32_spill]] }
 0x450   : > { %p2593_p1 = scmp.ge.s32.totalorder %s39_s21, 14   ;;  %s2739_s28 = sld [smem:[#allocation33_spill]] }
 0x451   : > { %s2740_s4 = smov %s2252_s29  ;;  %s2741_s3 = sld [smem:[#allocation34_spill]] }
 0x452   : > { %s2742_s16 = sld [smem:[#allocation44_spill]]  ;;  %s2747_s26 = smov %s1984_s27 }
 0x453   : > { %s2743_s17 = sld [smem:[#allocation37_spill]]  ;;  %s2748_s27 = smov %s2341_s23 }
 0x454   : > { %s2744_s18 = sld [smem:[#allocation38_spill]]  ;;  %s2749_s29 = smov %s1996_s30 }
 0x455   : > { %s2745_s19 = sld [smem:[#allocation40_spill]]  ;;  %s2750_s30 = smov %s2740_s4 }
 0x456   : > { %s2746_s20 = sld [smem:[#allocation42_spill]]  ;;  %s2751_s14 = smov %s2004_s15 }
 0x457   : > { %s2752_s15 = smov %s2741_s3  ;;  %38 = sbr.rel (!%p2593_p1) target bundleno = 33 (0x21), region = 196 }
 0x45c   :  { %1091 = vsyncpa [#allocation3], 1 }
 0x45d   :  { %1093 = vsyncpa [#allocation3 + $0x1], 1 }
 0x45e   :  { %1094 = vsyncpa [#allocation10], 1 }
 0x45f   :  { %1096 = vsyncpa [#allocation10 + $0x1], 1 }
 0x460   :  { %1097 = vsyncpa [#allocation13], 1 }
 0x461   :  { %1099 = vsyncpa [#allocation13 + $0x1], 1 }
 0x462   :  { %1100 = vsyncpa [#allocation16], 1 }
 0x463   :  { %1101 = vsyncpa [#allocation19], 1 }
 0x464   :  { %1102 = vsyncpa [#allocation4], 1 }
 0x465   :  { %1104 = vsyncpa [#allocation4 + $0x1], 1 }
 0x466   :  { %1105 = vsyncpa [#allocation5], 1 }
 0x467   :  { %1107 = vsyncpa [#allocation5 + $0x1], 1 }
 0x468   :  { %1108 = vsyncpa [#allocation7], 1 }

</bundles_post_ra>
